<compile_context>
chip_gen: v7x
topology: tpu7x:2x2x1
jax: 0.10.0
libtpu: 0.0.40
codegen_flags: <defaults>
</compile_context>

<pallas_src>
import functools
import math

import jax
import jax.numpy as jnp
import numpy as np
from jax.experimental import pallas as pl
from jax.experimental.pallas import tpu as pltpu


def decoder_block_kernel(
    x_ref, enc_ref,
    wqkv1_ref, wo1_ref,
    wq2_ref, wkv2_ref, wo2_ref,
    ln_ref,
    w1_ref, w2_ref,
    out_ref,
    *, num_heads, compute_dtype,
):
    S, E = x_ref.shape             # one batch element per grid step
    S_enc = enc_ref.shape[0]
    H = num_heads
    Dh = E // H
    f32 = jnp.float32

    cast = lambda v: v.astype(compute_dtype)   # no-op when compute_dtype == f32

    x = x_ref[...].astype(f32)       # residual stream stays f32
    enc = enc_ref[...].astype(f32)
    lnp = ln_ref[...]                # (6, E) f32: [g1,b1,g2,b2,g3,b3]

    def layer_norm(v, g, b, eps=1e-5):
        mean = jnp.mean(v, axis=-1, keepdims=True)
        var = jnp.mean((v - mean) ** 2, axis=-1, keepdims=True)
        return (v - mean) * jax.lax.rsqrt(var + eps) * g + b

    def split_heads(t2d):
        # (s, H*Dh) -> (H, s, Dh); done once per tensor (not per batch element).
        return jnp.stack([t2d[:, h * Dh:(h + 1) * Dh] for h in range(H)], axis=0)

    def merge_heads(t3d):
        # (H, s, Dh) -> (s, H*Dh) so the output projection is ONE K=E matmul.
        return jnp.concatenate([t3d[h] for h in range(H)], axis=-1)

    # Causal mask computed ONCE (hoisted); scores/mask math always f32.
    row = jax.lax.broadcasted_iota(jnp.int32, (S, S), 0)
    col = jax.lax.broadcasted_iota(jnp.int32, (S, S), 1)
    causal_mask = (col <= row)[None]            # (1, S, S), broadcasts over heads
    NEG_INF = jnp.float32(-1e30)

    def mha(q2d, kv2d, wo, is_causal):
        # q2d: (s_q, E) queries (1/sqrt(Dh) already folded into Wq wrapper-side)
        # kv2d: (s_kv, 2E) fused [K | V] projections
        q = split_heads(q2d)                    # (H, s_q, Dh)
        k = split_heads(kv2d[:, :E])            # (H, s_kv, Dh)
        v = split_heads(kv2d[:, E:])            # (H, s_kv, Dh)

        # One batched contraction over all heads (single MXU stream).
        s = jnp.einsum("hqd,hkd->hqk", cast(q), cast(k),
                       preferred_element_type=f32)         # (H, s_q, s_kv) f32
        if is_causal:
            s = jnp.where(causal_mask, s, NEG_INF)
        s = s - jnp.max(s, axis=-1, keepdims=True)
        p = jnp.exp(s)
        # softmax normalization on the EUP slot (approx reciprocal)
        p = p * pl.reciprocal(jnp.sum(p, axis=-1, keepdims=True), approx=True)

        o = jnp.einsum("hqk,hkd->hqd", cast(p), cast(v),
                       preferred_element_type=f32)         # (H, s_q, Dh)
        o2d = merge_heads(o)                               # (s_q, E)
        # Single output-projection matmul with K = E (fills MXU depth).
        return jnp.dot(cast(o2d), wo, preferred_element_type=f32)

    # ---- masked self-attention + residual + LN (dropout = identity) ----
    qkv1 = jnp.dot(cast(x), wqkv1_ref[...], preferred_element_type=f32)   # (S, 3E)
    a1 = mha(qkv1[:, :E], qkv1[:, E:], wo1_ref[...], True)
    x1 = layer_norm(x + a1, lnp[0:1, :], lnp[1:2, :])

    # ---- cross-attention on encoder output + residual + LN ----
    q2 = jnp.dot(cast(x1), wq2_ref[...], preferred_element_type=f32)
    kv2 = jnp.dot(cast(enc), wkv2_ref[...], preferred_element_type=f32)   # (S_enc, 2E)
    a2 = mha(q2, kv2, wo2_ref[...], False)
    x2 = layer_norm(x1 + a2, lnp[2:3, :], lnp[3:4, :])

    # ---- feed-forward (Linear -> ReLU -> Linear) + residual + LN ----
    hmid = jnp.maximum(jnp.dot(cast(x2), w1_ref[...], preferred_element_type=f32), 0.0)
    ffn = jnp.dot(cast(hmid), w2_ref[...], preferred_element_type=f32)
    x3 = layer_norm(x2 + ffn, lnp[4:5, :], lnp[5:6, :])

    out_ref[...] = x3.astype(out_ref.dtype)


def decoder_block(x, enc, params, *, num_heads, compute_dtype=jnp.float32):
    B, S, E = x.shape
    _, S_enc, _ = enc.shape
    assert E % num_heads == 0, "embed_dim must be divisible by num_heads"
    H = num_heads
    Dh = E // H
    hidden = params["w1"].shape[1]
    cdt = compute_dtype
    scale = 1.0 / math.sqrt(Dh)

    # Wrapper-side weight fusion / scale folding / dtype cast (trace-time, free).
    wqkv1 = jnp.concatenate(
        [params["wq1"] * scale, params["wk1"], params["wv1"]], axis=1).astype(cdt)
    wkv2 = jnp.concatenate([params["wk2"], params["wv2"]], axis=1).astype(cdt)
    wq2 = (params["wq2"] * scale).astype(cdt)
    wo1 = params["wo1"].astype(cdt)
    wo2 = params["wo2"].astype(cdt)
    w1 = params["w1"].astype(cdt)
    w2 = params["w2"].astype(cdt)
    # Six (1, E) LayerNorm params packed into one (6, E) operand.
    ln_pack = jnp.concatenate(
        [params["g1"], params["b1"], params["g2"], params["b2"],
         params["g3"], params["b3"]], axis=0).astype(jnp.float32)

    # Grid carries the batch; kernel sees 2-D (S, E) / (S_enc, E) activations.
    x2d = x.reshape(B * S, E)
    enc2d = enc.reshape(B * S_enc, E)

    def rep(shape):  # batch-invariant operand: same block every grid step
        return pl.BlockSpec(shape, lambda i, _n=len(shape): (0,) * _n)

    in_specs = [
        pl.BlockSpec((S, E), lambda i: (i, 0)),          # x (one batch / step)
        pl.BlockSpec((S_enc, E), lambda i: (i, 0)),      # encoder output
        rep((E, 3 * E)), rep((E, E)),                    # self-attn QKV / out proj
        rep((E, E)), rep((E, 2 * E)), rep((E, E)),       # cross-attn Q / KV / out
        rep((6, E)),                                     # packed LN gamma/beta
        rep((E, hidden)), rep((hidden, E)),              # FFN
    ]

    # Explicit VMEM budget from actual block + (double-buffered) weight bytes
    # plus headroom for the in-kernel intermediates (scores, FFN activations).
    w_itemsize = jnp.dtype(cdt).itemsize
    operand_bytes = (
        (S * E + S_enc * E + S * E) * 4                               # act blocks
        + (3 * E * E + E * E + E * E + 2 * E * E + E * E
           + E * hidden + hidden * E) * w_itemsize                    # weights
        + 6 * E * 4                                                   # LN pack
    )
    inter_bytes = (H * S * S + H * S * S_enc + S * hidden + 8 * S * E) * 4
    vmem_limit = int(min(100 << 20,
                         max(16 << 20, 2 * operand_bytes + 4 * inter_bytes + (2 << 20))))

    kernel = functools.partial(decoder_block_kernel, num_heads=num_heads,
                               compute_dtype=compute_dtype)
    out2d = pl.pallas_call(
        kernel,
        out_shape=jax.ShapeDtypeStruct((B * S, E), x.dtype),
        grid=(B,),
        in_specs=in_specs,
        out_specs=pl.BlockSpec((S, E), lambda i: (i, 0)),
        compiler_params=pltpu.CompilerParams(
            dimension_semantics=("parallel",),
            vmem_limit_bytes=vmem_limit),
    )(x2d, enc2d, wqkv1, wo1, wq2, wkv2, wo2, ln_pack, w1, w2)
    return out2d.reshape(B, S, E)


# ---------------------------------------------------------------------------
# Pure-JAX reference (same math) for correctness checking.
# ---------------------------------------------------------------------------
def _ref_mha(q_in, kv_in, wq, wk, wv, wo, num_heads, causal):
    Sq, E = q_in.shape
    Sk = kv_in.shape[0]
    Dh = E // num_heads
    q = (q_in @ wq).reshape(Sq, num_heads, Dh).transpose(1, 0, 2)
    k = (kv_in @ wk).reshape(Sk, num_heads, Dh).transpose(1, 0, 2)
    v = (kv_in @ wv).reshape(Sk, num_heads, Dh).transpose(1, 0, 2)
    s = jnp.einsum("hqd,hkd->hqk", q, k) / math.sqrt(Dh)
    if causal:
        mask = jnp.tril(jnp.ones((Sq, Sk), bool))
        s = jnp.where(mask[None], s, -1e30)
    p = jax.nn.softmax(s, axis=-1)
    o = jnp.einsum("hqk,hkd->hqd", p, v).transpose(1, 0, 2).reshape(Sq, E)
    return o @ wo


def _ref_ln(v, g, b, eps=1e-5):
    m = jnp.mean(v, -1, keepdims=True)
    var = jnp.mean((v - m) ** 2, -1, keepdims=True)
    return (v - m) / jnp.sqrt(var + eps) * g + b


def decoder_block_ref(x, enc, p, num_heads):
    def one(xb, eb):
        a1 = _ref_mha(xb, xb, p["wq1"], p["wk1"], p["wv1"], p["wo1"], num_heads, True)
        x1 = _ref_ln(xb + a1, p["g1"], p["b1"])
        a2 = _ref_mha(x1, eb, p["wq2"], p["wk2"], p["wv2"], p["wo2"], num_heads, False)
        x2 = _ref_ln(x1 + a2, p["g2"], p["b2"])
        f = jnp.maximum(x2 @ p["w1"], 0.0) @ p["w2"]
        return _ref_ln(x2 + f, p["g3"], p["b3"])
    return jax.vmap(one)(x, enc)


if __name__ == "__main__":
    B, S, S_enc = 2, 8, 16
    E, HIDDEN, NUM_HEADS = 32, 64, 4

    key = jax.random.PRNGKey(0)
    keys = jax.random.split(key, 16)

    def w(k, shape, scale=0.05):
        return (scale * jax.random.normal(k, shape)).astype(jnp.float32)

    params = {
        "wq1": w(keys[0], (E, E)), "wk1": w(keys[1], (E, E)),
        "wv1": w(keys[2], (E, E)), "wo1": w(keys[3], (E, E)),
        "wq2": w(keys[4], (E, E)), "wk2": w(keys[5], (E, E)),
        "wv2": w(keys[6], (E, E)), "wo2": w(keys[7], (E, E)),
        "g1": jnp.ones((1, E), jnp.float32), "b1": jnp.zeros((1, E), jnp.float32),
        "g2": jnp.ones((1, E), jnp.float32), "b2": jnp.zeros((1, E), jnp.float32),
        "g3": jnp.ones((1, E), jnp.float32), "b3": jnp.zeros((1, E), jnp.float32),
        "w1": w(keys[8], (E, HIDDEN)), "w2": w(keys[9], (HIDDEN, E)),
    }

    x = jax.random.normal(keys[10], (B, S, E), jnp.float32)
    enc = jax.random.normal(keys[11], (B, S_enc, E), jnp.float32)

    ref = decoder_block_ref(x, enc, params, NUM_HEADS)

    # f32 MXU-input path. Tolerance slightly loosened for the approximate
    # (EUP) reciprocal used in the softmax normalization.
    out = decoder_block(x, enc, params, num_heads=NUM_HEADS)
    out = jax.block_until_ready(out)
    np.testing.assert_allclose(np.asarray(out), np.asarray(ref), atol=2e-2, rtol=2e-2)

    # bf16 MXU-input path (recommended on v5e/v6e/v7x: native bf16 MXU, half
    # the weight DMA bytes); accumulation + softmax + mask + LN stay f32.
    out_bf16 = decoder_block(x, enc, params, num_heads=NUM_HEADS,
                             compute_dtype=jnp.bfloat16)
    out_bf16 = jax.block_until_ready(out_bf16)
    diff = np.abs(np.asarray(out_bf16) - np.asarray(ref))
    assert np.all(np.isfinite(np.asarray(out_bf16))) and np.max(diff) < 0.25

    print("KERNEL_OK")
</pallas_src>

<mosaic_0001>
module attributes {stable_mosaic.version = 11 : i64} {
  func.func @decoder_block_kernel(%arg0: i32, %arg1: memref<8x32xf32, #tpu.memory_space<vmem>>, %arg2: memref<16x32xf32, #tpu.memory_space<vmem>>, %arg3: memref<32x96xf32, #tpu.memory_space<vmem>>, %arg4: memref<32x32xf32, #tpu.memory_space<vmem>>, %arg5: memref<32x32xf32, #tpu.memory_space<vmem>>, %arg6: memref<32x64xf32, #tpu.memory_space<vmem>>, %arg7: memref<32x32xf32, #tpu.memory_space<vmem>>, %arg8: memref<6x32xf32, #tpu.memory_space<vmem>>, %arg9: memref<32x64xf32, #tpu.memory_space<vmem>>, %arg10: memref<64x32xf32, #tpu.memory_space<vmem>>, %arg11: memref<8x32xf32, #tpu.memory_space<vmem>>) attributes {dimension_semantics = [#tpu.dimension_semantics<parallel>], iteration_bounds = array<i64: 2>, scalar_prefetch = 0 : i64, scratch_operands = 0 : i64, tpu.core_type = #tpu.core_type<tc>, window_params = [{transform_indices = @transform_0, window_bounds = array<i64: 8, 32>}, {transform_indices = @transform_1, window_bounds = array<i64: 16, 32>}, {pipeline_mode = #tpu.pipeline_mode<synchronous>, transform_indices = @transform_2, window_bounds = array<i64: 32, 96>}, {pipeline_mode = #tpu.pipeline_mode<synchronous>, transform_indices = @transform_3, window_bounds = array<i64: 32, 32>}, {pipeline_mode = #tpu.pipeline_mode<synchronous>, transform_indices = @transform_4, window_bounds = array<i64: 32, 32>}, {pipeline_mode = #tpu.pipeline_mode<synchronous>, transform_indices = @transform_5, window_bounds = array<i64: 32, 64>}, {pipeline_mode = #tpu.pipeline_mode<synchronous>, transform_indices = @transform_6, window_bounds = array<i64: 32, 32>}, {pipeline_mode = #tpu.pipeline_mode<synchronous>, transform_indices = @transform_7, window_bounds = array<i64: 6, 32>}, {pipeline_mode = #tpu.pipeline_mode<synchronous>, transform_indices = @transform_8, window_bounds = array<i64: 32, 64>}, {pipeline_mode = #tpu.pipeline_mode<synchronous>, transform_indices = @transform_9, window_bounds = array<i64: 64, 32>}, {transform_indices = @transform_10, window_bounds = array<i64: 8, 32>}]} {
    %c0 = arith.constant 0 : index
    %c0_0 = arith.constant 0 : index
    %0 = vector.load %arg1[%c0, %c0_0] : memref<8x32xf32, #tpu.memory_space<vmem>>, vector<8x32xf32>
    %c0_1 = arith.constant 0 : index
    %c0_2 = arith.constant 0 : index
    %1 = vector.load %arg2[%c0_1, %c0_2] : memref<16x32xf32, #tpu.memory_space<vmem>>, vector<16x32xf32>
    %c0_3 = arith.constant 0 : index
    %c0_4 = arith.constant 0 : index
    %2 = vector.load %arg8[%c0_3, %c0_4] : memref<6x32xf32, #tpu.memory_space<vmem>>, vector<6x32xf32>
    %3 = tpu.iota {dimensions = array<i32: 0>} : vector<8x8xi32>
    %4 = tpu.iota {dimensions = array<i32: 1>} : vector<8x8xi32>
    %5 = arith.cmpi sle, %4, %3 : vector<8x8xi32>
    %6 = vector.shape_cast %5 : vector<8x8xi1> to vector<1x8x8xi1>
    %c0_5 = arith.constant 0 : index
    %c0_6 = arith.constant 0 : index
    %7 = vector.load %arg3[%c0_5, %c0_6] : memref<32x96xf32, #tpu.memory_space<vmem>>, vector<32x96xf32>
    %cst = arith.constant dense<0.000000e+00> : vector<8x96xf32>
    %8 = tpu.matmul %0, %7, %cst {dimension_numbers = #tpu.dot_dimension_numbers<[1], [0], [0], [1], [0, 0, 1, 1], [], []>} : vector<8x32xf32>, vector<32x96xf32>, vector<8x96xf32> -> vector<8x96xf32>
    %9 = vector.extract_strided_slice %8 {offsets = [0, 0], sizes = [8, 32], strides = [1, 1]} : vector<8x96xf32> to vector<8x32xf32>
    %10 = vector.extract_strided_slice %8 {offsets = [0, 32], sizes = [8, 64], strides = [1, 1]} : vector<8x96xf32> to vector<8x64xf32>
    %c0_7 = arith.constant 0 : index
    %c0_8 = arith.constant 0 : index
    %11 = vector.load %arg4[%c0_7, %c0_8] : memref<32x32xf32, #tpu.memory_space<vmem>>, vector<32x32xf32>
    %12 = vector.extract_strided_slice %9 {offsets = [0, 0], sizes = [8, 8], strides = [1, 1]} : vector<8x32xf32> to vector<8x8xf32>
    %13 = vector.extract_strided_slice %9 {offsets = [0, 8], sizes = [8, 8], strides = [1, 1]} : vector<8x32xf32> to vector<8x8xf32>
    %14 = vector.extract_strided_slice %9 {offsets = [0, 16], sizes = [8, 8], strides = [1, 1]} : vector<8x32xf32> to vector<8x8xf32>
    %15 = vector.extract_strided_slice %9 {offsets = [0, 24], sizes = [8, 8], strides = [1, 1]} : vector<8x32xf32> to vector<8x8xf32>
    %16 = vector.shape_cast %12 : vector<8x8xf32> to vector<1x8x8xf32>
    %17 = vector.shape_cast %13 : vector<8x8xf32> to vector<1x8x8xf32>
    %18 = vector.shape_cast %14 : vector<8x8xf32> to vector<1x8x8xf32>
    %19 = vector.shape_cast %15 : vector<8x8xf32> to vector<1x8x8xf32>
    %20 = tpu.concatenate %16, %17, %18, %19 in 0 : vector<1x8x8xf32>, vector<1x8x8xf32>, vector<1x8x8xf32>, vector<1x8x8xf32> -> vector<4x8x8xf32>
    %21 = vector.extract_strided_slice %10 {offsets = [0, 0], sizes = [8, 32], strides = [1, 1]} : vector<8x64xf32> to vector<8x32xf32>
    %22 = vector.extract_strided_slice %21 {offsets = [0, 0], sizes = [8, 8], strides = [1, 1]} : vector<8x32xf32> to vector<8x8xf32>
    %23 = vector.extract_strided_slice %21 {offsets = [0, 8], sizes = [8, 8], strides = [1, 1]} : vector<8x32xf32> to vector<8x8xf32>
    %24 = vector.extract_strided_slice %21 {offsets = [0, 16], sizes = [8, 8], strides = [1, 1]} : vector<8x32xf32> to vector<8x8xf32>
    %25 = vector.extract_strided_slice %21 {offsets = [0, 24], sizes = [8, 8], strides = [1, 1]} : vector<8x32xf32> to vector<8x8xf32>
    %26 = vector.shape_cast %22 : vector<8x8xf32> to vector<1x8x8xf32>
    %27 = vector.shape_cast %23 : vector<8x8xf32> to vector<1x8x8xf32>
    %28 = vector.shape_cast %24 : vector<8x8xf32> to vector<1x8x8xf32>
    %29 = vector.shape_cast %25 : vector<8x8xf32> to vector<1x8x8xf32>
    %30 = tpu.concatenate %26, %27, %28, %29 in 0 : vector<1x8x8xf32>, vector<1x8x8xf32>, vector<1x8x8xf32>, vector<1x8x8xf32> -> vector<4x8x8xf32>
    %31 = vector.extract_strided_slice %10 {offsets = [0, 32], sizes = [8, 32], strides = [1, 1]} : vector<8x64xf32> to vector<8x32xf32>
    %32 = vector.extract_strided_slice %31 {offsets = [0, 0], sizes = [8, 8], strides = [1, 1]} : vector<8x32xf32> to vector<8x8xf32>
    %33 = vector.extract_strided_slice %31 {offsets = [0, 8], sizes = [8, 8], strides = [1, 1]} : vector<8x32xf32> to vector<8x8xf32>
    %34 = vector.extract_strided_slice %31 {offsets = [0, 16], sizes = [8, 8], strides = [1, 1]} : vector<8x32xf32> to vector<8x8xf32>
    %35 = vector.extract_strided_slice %31 {offsets = [0, 24], sizes = [8, 8], strides = [1, 1]} : vector<8x32xf32> to vector<8x8xf32>
    %36 = vector.shape_cast %32 : vector<8x8xf32> to vector<1x8x8xf32>
    %37 = vector.shape_cast %33 : vector<8x8xf32> to vector<1x8x8xf32>
    %38 = vector.shape_cast %34 : vector<8x8xf32> to vector<1x8x8xf32>
    %39 = vector.shape_cast %35 : vector<8x8xf32> to vector<1x8x8xf32>
    %40 = tpu.concatenate %36, %37, %38, %39 in 0 : vector<1x8x8xf32>, vector<1x8x8xf32>, vector<1x8x8xf32>, vector<1x8x8xf32> -> vector<4x8x8xf32>
    "tpu.trace_start"() <{level = 10 : i32, message = "hqd,hkd->hqk"}> : () -> ()
    %cst_9 = arith.constant dense<0.000000e+00> : vector<4x8x8xf32>
    %41 = tpu.matmul %20, %30, %cst_9 {dimension_numbers = #tpu.dot_dimension_numbers<[2], [2], [1], [1], [0, 0, 0, 1, 1, 1], [0], [0]>} : vector<4x8x8xf32>, vector<4x8x8xf32>, vector<4x8x8xf32> -> vector<4x8x8xf32>
    %cst_10 = arith.constant -1.000000e+30 : f32
    "tpu.trace_stop"() : () -> ()
    %42 = vector.shape_cast %6 : vector<1x8x8xi1> to vector<1x8x8xi1>
    %43 = vector.broadcast %42 : vector<1x8x8xi1> to vector<4x8x8xi1>
    %44 = vector.broadcast %cst_10 : f32 to vector<4x8x8xf32>
    %45 = arith.select %43, %41, %44 : vector<4x8x8xi1>, vector<4x8x8xf32>
    %cst_11 = arith.constant dense<0xFF800000> : vector<4x8xf32>
    %46 = vector.multi_reduction <maximumf>, %45, %cst_11 [2] : vector<4x8x8xf32> to vector<4x8xf32>
    %47 = vector.shape_cast %46 : vector<4x8xf32> to vector<4x8x1xf32>
    %48 = vector.broadcast %47 : vector<4x8x1xf32> to vector<4x8x8xf32>
    %49 = arith.subf %45, %48 : vector<4x8x8xf32>
    %50 = math.exp %49 : vector<4x8x8xf32>
    %cst_12 = arith.constant dense<0.000000e+00> : vector<4x8xf32>
    %51 = vector.multi_reduction <add>, %50, %cst_12 [2] : vector<4x8x8xf32> to vector<4x8xf32>
    %52 = vector.shape_cast %51 : vector<4x8xf32> to vector<4x8x1xf32>
    %53 = tpu.reciprocal %52 {approx = true} : vector<4x8x1xf32> -> vector<4x8x1xf32>
    %54 = vector.broadcast %53 : vector<4x8x1xf32> to vector<4x8x8xf32>
    %55 = arith.mulf %50, %54 : vector<4x8x8xf32>
    "tpu.trace_start"() <{level = 10 : i32, message = "hqk,hkd->hqd"}> : () -> ()
    %cst_13 = arith.constant dense<0.000000e+00> : vector<4x8x8xf32>
    %56 = tpu.matmul %55, %40, %cst_13 {dimension_numbers = #tpu.dot_dimension_numbers<[2], [1], [1], [2], [0, 0, 0, 1, 1, 2], [0], [0]>} : vector<4x8x8xf32>, vector<4x8x8xf32>, vector<4x8x8xf32> -> vector<4x8x8xf32>
    "tpu.trace_stop"() : () -> ()
    %57 = vector.extract_strided_slice %56 {offsets = [0, 0, 0], sizes = [1, 8, 8], strides = [1, 1, 1]} : vector<4x8x8xf32> to vector<1x8x8xf32>
    %58 = vector.shape_cast %57 : vector<1x8x8xf32> to vector<8x8xf32>
    %59 = vector.extract_strided_slice %56 {offsets = [1, 0, 0], sizes = [1, 8, 8], strides = [1, 1, 1]} : vector<4x8x8xf32> to vector<1x8x8xf32>
    %60 = vector.shape_cast %59 : vector<1x8x8xf32> to vector<8x8xf32>
    %61 = vector.extract_strided_slice %56 {offsets = [2, 0, 0], sizes = [1, 8, 8], strides = [1, 1, 1]} : vector<4x8x8xf32> to vector<1x8x8xf32>
    %62 = vector.shape_cast %61 : vector<1x8x8xf32> to vector<8x8xf32>
    %63 = vector.extract_strided_slice %56 {offsets = [3, 0, 0], sizes = [1, 8, 8], strides = [1, 1, 1]} : vector<4x8x8xf32> to vector<1x8x8xf32>
    %64 = vector.shape_cast %63 : vector<1x8x8xf32> to vector<8x8xf32>
    %65 = tpu.concatenate %58, %60, %62, %64 in 1 : vector<8x8xf32>, vector<8x8xf32>, vector<8x8xf32>, vector<8x8xf32> -> vector<8x32xf32>
    %cst_14 = arith.constant dense<0.000000e+00> : vector<8x32xf32>
    %66 = tpu.matmul %65, %11, %cst_14 {dimension_numbers = #tpu.dot_dimension_numbers<[1], [0], [0], [1], [0, 0, 1, 1], [], []>} : vector<8x32xf32>, vector<32x32xf32>, vector<8x32xf32> -> vector<8x32xf32>
    %67 = arith.addf %0, %66 : vector<8x32xf32>
    %68 = vector.extract_strided_slice %2 {offsets = [0, 0], sizes = [1, 32], strides = [1, 1]} : vector<6x32xf32> to vector<1x32xf32>
    %69 = vector.extract_strided_slice %2 {offsets = [1, 0], sizes = [1, 32], strides = [1, 1]} : vector<6x32xf32> to vector<1x32xf32>
    %cst_15 = arith.constant dense<0.000000e+00> : vector<8xf32>
    %70 = vector.multi_reduction <add>, %67, %cst_15 [1] : vector<8x32xf32> to vector<8xf32>
    %71 = vector.shape_cast %70 : vector<8xf32> to vector<8x1xf32>
    %cst_16 = arith.constant 3.200000e+01 : f32
    %72 = vector.broadcast %cst_16 : f32 to vector<8x1xf32>
    %73 = arith.divf %71, %72 : vector<8x1xf32>
    %74 = vector.broadcast %73 : vector<8x1xf32> to vector<8x32xf32>
    %75 = arith.subf %67, %74 : vector<8x32xf32>
    %76 = arith.mulf %75, %75 : vector<8x32xf32>
    %cst_17 = arith.constant dense<0.000000e+00> : vector<8xf32>
    %77 = vector.multi_reduction <add>, %76, %cst_17 [1] : vector<8x32xf32> to vector<8xf32>
    %78 = vector.shape_cast %77 : vector<8xf32> to vector<8x1xf32>
    %cst_18 = arith.constant 3.200000e+01 : f32
    %79 = vector.broadcast %cst_18 : f32 to vector<8x1xf32>
    %80 = arith.divf %78, %79 : vector<8x1xf32>
    %81 = vector.broadcast %73 : vector<8x1xf32> to vector<8x32xf32>
    %82 = arith.subf %67, %81 : vector<8x32xf32>
    %cst_19 = arith.constant 9.99999974E-6 : f32
    %83 = vector.broadcast %cst_19 : f32 to vector<8x1xf32>
    %84 = arith.addf %80, %83 : vector<8x1xf32>
    %85 = math.rsqrt %84 : vector<8x1xf32>
    %86 = vector.broadcast %85 : vector<8x1xf32> to vector<8x32xf32>
    %87 = arith.mulf %82, %86 : vector<8x32xf32>
    %88 = vector.broadcast %68 : vector<1x32xf32> to vector<8x32xf32>
    %89 = arith.mulf %87, %88 : vector<8x32xf32>
    %90 = vector.broadcast %69 : vector<1x32xf32> to vector<8x32xf32>
    %91 = arith.addf %89, %90 : vector<8x32xf32>
    %c0_20 = arith.constant 0 : index
    %c0_21 = arith.constant 0 : index
    %92 = vector.load %arg5[%c0_20, %c0_21] : memref<32x32xf32, #tpu.memory_space<vmem>>, vector<32x32xf32>
    %cst_22 = arith.constant dense<0.000000e+00> : vector<8x32xf32>
    %93 = tpu.matmul %91, %92, %cst_22 {dimension_numbers = #tpu.dot_dimension_numbers<[1], [0], [0], [1], [0, 0, 1, 1], [], []>} : vector<8x32xf32>, vector<32x32xf32>, vector<8x32xf32> -> vector<8x32xf32>
    %c0_23 = arith.constant 0 : index
    %c0_24 = arith.constant 0 : index
    %94 = vector.load %arg6[%c0_23, %c0_24] : memref<32x64xf32, #tpu.memory_space<vmem>>, vector<32x64xf32>
    %cst_25 = arith.constant dense<0.000000e+00> : vector<16x64xf32>
    %95 = tpu.matmul %1, %94, %cst_25 {dimension_numbers = #tpu.dot_dimension_numbers<[1], [0], [0], [1], [0, 0, 1, 1], [], []>} : vector<16x32xf32>, vector<32x64xf32>, vector<16x64xf32> -> vector<16x64xf32>
    %c0_26 = arith.constant 0 : index
    %c0_27 = arith.constant 0 : index
    %96 = vector.load %arg7[%c0_26, %c0_27] : memref<32x32xf32, #tpu.memory_space<vmem>>, vector<32x32xf32>
    %97 = vector.extract_strided_slice %93 {offsets = [0, 0], sizes = [8, 8], strides = [1, 1]} : vector<8x32xf32> to vector<8x8xf32>
    %98 = vector.extract_strided_slice %93 {offsets = [0, 8], sizes = [8, 8], strides = [1, 1]} : vector<8x32xf32> to vector<8x8xf32>
    %99 = vector.extract_strided_slice %93 {offsets = [0, 16], sizes = [8, 8], strides = [1, 1]} : vector<8x32xf32> to vector<8x8xf32>
    %100 = vector.extract_strided_slice %93 {offsets = [0, 24], sizes = [8, 8], strides = [1, 1]} : vector<8x32xf32> to vector<8x8xf32>
    %101 = vector.shape_cast %97 : vector<8x8xf32> to vector<1x8x8xf32>
    %102 = vector.shape_cast %98 : vector<8x8xf32> to vector<1x8x8xf32>
    %103 = vector.shape_cast %99 : vector<8x8xf32> to vector<1x8x8xf32>
    %104 = vector.shape_cast %100 : vector<8x8xf32> to vector<1x8x8xf32>
    %105 = tpu.concatenate %101, %102, %103, %104 in 0 : vector<1x8x8xf32>, vector<1x8x8xf32>, vector<1x8x8xf32>, vector<1x8x8xf32> -> vector<4x8x8xf32>
    %106 = vector.extract_strided_slice %95 {offsets = [0, 0], sizes = [16, 32], strides = [1, 1]} : vector<16x64xf32> to vector<16x32xf32>
    %107 = vector.extract_strided_slice %106 {offsets = [0, 0], sizes = [16, 8], strides = [1, 1]} : vector<16x32xf32> to vector<16x8xf32>
    %108 = vector.extract_strided_slice %106 {offsets = [0, 8], sizes = [16, 8], strides = [1, 1]} : vector<16x32xf32> to vector<16x8xf32>
    %109 = vector.extract_strided_slice %106 {offsets = [0, 16], sizes = [16, 8], strides = [1, 1]} : vector<16x32xf32> to vector<16x8xf32>
    %110 = vector.extract_strided_slice %106 {offsets = [0, 24], sizes = [16, 8], strides = [1, 1]} : vector<16x32xf32> to vector<16x8xf32>
    %111 = vector.shape_cast %107 : vector<16x8xf32> to vector<1x16x8xf32>
    %112 = vector.shape_cast %108 : vector<16x8xf32> to vector<1x16x8xf32>
    %113 = vector.shape_cast %109 : vector<16x8xf32> to vector<1x16x8xf32>
    %114 = vector.shape_cast %110 : vector<16x8xf32> to vector<1x16x8xf32>
    %115 = tpu.concatenate %111, %112, %113, %114 in 0 : vector<1x16x8xf32>, vector<1x16x8xf32>, vector<1x16x8xf32>, vector<1x16x8xf32> -> vector<4x16x8xf32>
    %116 = vector.extract_strided_slice %95 {offsets = [0, 32], sizes = [16, 32], strides = [1, 1]} : vector<16x64xf32> to vector<16x32xf32>
    %117 = vector.extract_strided_slice %116 {offsets = [0, 0], sizes = [16, 8], strides = [1, 1]} : vector<16x32xf32> to vector<16x8xf32>
    %118 = vector.extract_strided_slice %116 {offsets = [0, 8], sizes = [16, 8], strides = [1, 1]} : vector<16x32xf32> to vector<16x8xf32>
    %119 = vector.extract_strided_slice %116 {offsets = [0, 16], sizes = [16, 8], strides = [1, 1]} : vector<16x32xf32> to vector<16x8xf32>
    %120 = vector.extract_strided_slice %116 {offsets = [0, 24], sizes = [16, 8], strides = [1, 1]} : vector<16x32xf32> to vector<16x8xf32>
    %121 = vector.shape_cast %117 : vector<16x8xf32> to vector<1x16x8xf32>
    %122 = vector.shape_cast %118 : vector<16x8xf32> to vector<1x16x8xf32>
    %123 = vector.shape_cast %119 : vector<16x8xf32> to vector<1x16x8xf32>
    %124 = vector.shape_cast %120 : vector<16x8xf32> to vector<1x16x8xf32>
    %125 = tpu.concatenate %121, %122, %123, %124 in 0 : vector<1x16x8xf32>, vector<1x16x8xf32>, vector<1x16x8xf32>, vector<1x16x8xf32> -> vector<4x16x8xf32>
    "tpu.trace_start"() <{level = 10 : i32, message = "hqd,hkd->hqk"}> : () -> ()
    %cst_28 = arith.constant dense<0.000000e+00> : vector<4x8x16xf32>
    %126 = tpu.matmul %105, %115, %cst_28 {dimension_numbers = #tpu.dot_dimension_numbers<[2], [2], [1], [1], [0, 0, 0, 1, 1, 1], [0], [0]>} : vector<4x8x8xf32>, vector<4x16x8xf32>, vector<4x8x16xf32> -> vector<4x8x16xf32>
    "tpu.trace_stop"() : () -> ()
    %cst_29 = arith.constant dense<0xFF800000> : vector<4x8xf32>
    %127 = vector.multi_reduction <maximumf>, %126, %cst_29 [2] : vector<4x8x16xf32> to vector<4x8xf32>
    %128 = vector.shape_cast %127 : vector<4x8xf32> to vector<4x8x1xf32>
    %129 = vector.broadcast %128 : vector<4x8x1xf32> to vector<4x8x16xf32>
    %130 = arith.subf %126, %129 : vector<4x8x16xf32>
    %131 = math.exp %130 : vector<4x8x16xf32>
    %cst_30 = arith.constant dense<0.000000e+00> : vector<4x8xf32>
    %132 = vector.multi_reduction <add>, %131, %cst_30 [2] : vector<4x8x16xf32> to vector<4x8xf32>
    %133 = vector.shape_cast %132 : vector<4x8xf32> to vector<4x8x1xf32>
    %134 = tpu.reciprocal %133 {approx = true} : vector<4x8x1xf32> -> vector<4x8x1xf32>
    %135 = vector.broadcast %134 : vector<4x8x1xf32> to vector<4x8x16xf32>
    %136 = arith.mulf %131, %135 : vector<4x8x16xf32>
    "tpu.trace_start"() <{level = 10 : i32, message = "hqk,hkd->hqd"}> : () -> ()
    %cst_31 = arith.constant dense<0.000000e+00> : vector<4x8x8xf32>
    %137 = tpu.matmul %136, %125, %cst_31 {dimension_numbers = #tpu.dot_dimension_numbers<[2], [1], [1], [2], [0, 0, 0, 1, 1, 2], [0], [0]>} : vector<4x8x16xf32>, vector<4x16x8xf32>, vector<4x8x8xf32> -> vector<4x8x8xf32>
    "tpu.trace_stop"() : () -> ()
    %138 = vector.extract_strided_slice %137 {offsets = [0, 0, 0], sizes = [1, 8, 8], strides = [1, 1, 1]} : vector<4x8x8xf32> to vector<1x8x8xf32>
    %139 = vector.shape_cast %138 : vector<1x8x8xf32> to vector<8x8xf32>
    %140 = vector.extract_strided_slice %137 {offsets = [1, 0, 0], sizes = [1, 8, 8], strides = [1, 1, 1]} : vector<4x8x8xf32> to vector<1x8x8xf32>
    %141 = vector.shape_cast %140 : vector<1x8x8xf32> to vector<8x8xf32>
    %142 = vector.extract_strided_slice %137 {offsets = [2, 0, 0], sizes = [1, 8, 8], strides = [1, 1, 1]} : vector<4x8x8xf32> to vector<1x8x8xf32>
    %143 = vector.shape_cast %142 : vector<1x8x8xf32> to vector<8x8xf32>
    %144 = vector.extract_strided_slice %137 {offsets = [3, 0, 0], sizes = [1, 8, 8], strides = [1, 1, 1]} : vector<4x8x8xf32> to vector<1x8x8xf32>
    %145 = vector.shape_cast %144 : vector<1x8x8xf32> to vector<8x8xf32>
    %146 = tpu.concatenate %139, %141, %143, %145 in 1 : vector<8x8xf32>, vector<8x8xf32>, vector<8x8xf32>, vector<8x8xf32> -> vector<8x32xf32>
    %cst_32 = arith.constant dense<0.000000e+00> : vector<8x32xf32>
    %147 = tpu.matmul %146, %96, %cst_32 {dimension_numbers = #tpu.dot_dimension_numbers<[1], [0], [0], [1], [0, 0, 1, 1], [], []>} : vector<8x32xf32>, vector<32x32xf32>, vector<8x32xf32> -> vector<8x32xf32>
    %148 = arith.addf %91, %147 : vector<8x32xf32>
    %149 = vector.extract_strided_slice %2 {offsets = [2, 0], sizes = [1, 32], strides = [1, 1]} : vector<6x32xf32> to vector<1x32xf32>
    %150 = vector.extract_strided_slice %2 {offsets = [3, 0], sizes = [1, 32], strides = [1, 1]} : vector<6x32xf32> to vector<1x32xf32>
    %cst_33 = arith.constant dense<0.000000e+00> : vector<8xf32>
    %151 = vector.multi_reduction <add>, %148, %cst_33 [1] : vector<8x32xf32> to vector<8xf32>
    %152 = vector.shape_cast %151 : vector<8xf32> to vector<8x1xf32>
    %cst_34 = arith.constant 3.200000e+01 : f32
    %153 = vector.broadcast %cst_34 : f32 to vector<8x1xf32>
    %154 = arith.divf %152, %153 : vector<8x1xf32>
    %155 = vector.broadcast %154 : vector<8x1xf32> to vector<8x32xf32>
    %156 = arith.subf %148, %155 : vector<8x32xf32>
    %157 = arith.mulf %156, %156 : vector<8x32xf32>
    %cst_35 = arith.constant dense<0.000000e+00> : vector<8xf32>
    %158 = vector.multi_reduction <add>, %157, %cst_35 [1] : vector<8x32xf32> to vector<8xf32>
    %159 = vector.shape_cast %158 : vector<8xf32> to vector<8x1xf32>
    %cst_36 = arith.constant 3.200000e+01 : f32
    %160 = vector.broadcast %cst_36 : f32 to vector<8x1xf32>
    %161 = arith.divf %159, %160 : vector<8x1xf32>
    %162 = vector.broadcast %154 : vector<8x1xf32> to vector<8x32xf32>
    %163 = arith.subf %148, %162 : vector<8x32xf32>
    %cst_37 = arith.constant 9.99999974E-6 : f32
    %164 = vector.broadcast %cst_37 : f32 to vector<8x1xf32>
    %165 = arith.addf %161, %164 : vector<8x1xf32>
    %166 = math.rsqrt %165 : vector<8x1xf32>
    %167 = vector.broadcast %166 : vector<8x1xf32> to vector<8x32xf32>
    %168 = arith.mulf %163, %167 : vector<8x32xf32>
    %169 = vector.broadcast %149 : vector<1x32xf32> to vector<8x32xf32>
    %170 = arith.mulf %168, %169 : vector<8x32xf32>
    %171 = vector.broadcast %150 : vector<1x32xf32> to vector<8x32xf32>
    %172 = arith.addf %170, %171 : vector<8x32xf32>
    %c0_38 = arith.constant 0 : index
    %c0_39 = arith.constant 0 : index
    %173 = vector.load %arg9[%c0_38, %c0_39] : memref<32x64xf32, #tpu.memory_space<vmem>>, vector<32x64xf32>
    %cst_40 = arith.constant dense<0.000000e+00> : vector<8x64xf32>
    %174 = tpu.matmul %172, %173, %cst_40 {dimension_numbers = #tpu.dot_dimension_numbers<[1], [0], [0], [1], [0, 0, 1, 1], [], []>} : vector<8x32xf32>, vector<32x64xf32>, vector<8x64xf32> -> vector<8x64xf32>
    %cst_41 = arith.constant 0.000000e+00 : f32
    %175 = vector.broadcast %cst_41 : f32 to vector<8x64xf32>
    %176 = arith.maximumf %174, %175 : vector<8x64xf32>
    %c0_42 = arith.constant 0 : index
    %c0_43 = arith.constant 0 : index
    %177 = vector.load %arg10[%c0_42, %c0_43] : memref<64x32xf32, #tpu.memory_space<vmem>>, vector<64x32xf32>
    %cst_44 = arith.constant dense<0.000000e+00> : vector<8x32xf32>
    %178 = tpu.matmul %176, %177, %cst_44 {dimension_numbers = #tpu.dot_dimension_numbers<[1], [0], [0], [1], [0, 0, 1, 1], [], []>} : vector<8x64xf32>, vector<64x32xf32>, vector<8x32xf32> -> vector<8x32xf32>
    %179 = arith.addf %172, %178 : vector<8x32xf32>
    %180 = vector.extract_strided_slice %2 {offsets = [4, 0], sizes = [1, 32], strides = [1, 1]} : vector<6x32xf32> to vector<1x32xf32>
    %181 = vector.extract_strided_slice %2 {offsets = [5, 0], sizes = [1, 32], strides = [1, 1]} : vector<6x32xf32> to vector<1x32xf32>
    %cst_45 = arith.constant dense<0.000000e+00> : vector<8xf32>
    %182 = vector.multi_reduction <add>, %179, %cst_45 [1] : vector<8x32xf32> to vector<8xf32>
    %183 = vector.shape_cast %182 : vector<8xf32> to vector<8x1xf32>
    %cst_46 = arith.constant 3.200000e+01 : f32
    %184 = vector.broadcast %cst_46 : f32 to vector<8x1xf32>
    %185 = arith.divf %183, %184 : vector<8x1xf32>
    %186 = vector.broadcast %185 : vector<8x1xf32> to vector<8x32xf32>
    %187 = arith.subf %179, %186 : vector<8x32xf32>
    %188 = arith.mulf %187, %187 : vector<8x32xf32>
    %cst_47 = arith.constant dense<0.000000e+00> : vector<8xf32>
    %189 = vector.multi_reduction <add>, %188, %cst_47 [1] : vector<8x32xf32> to vector<8xf32>
    %190 = vector.shape_cast %189 : vector<8xf32> to vector<8x1xf32>
    %cst_48 = arith.constant 3.200000e+01 : f32
    %191 = vector.broadcast %cst_48 : f32 to vector<8x1xf32>
    %192 = arith.divf %190, %191 : vector<8x1xf32>
    %193 = vector.broadcast %185 : vector<8x1xf32> to vector<8x32xf32>
    %194 = arith.subf %179, %193 : vector<8x32xf32>
    %cst_49 = arith.constant 9.99999974E-6 : f32
    %195 = vector.broadcast %cst_49 : f32 to vector<8x1xf32>
    %196 = arith.addf %192, %195 : vector<8x1xf32>
    %197 = math.rsqrt %196 : vector<8x1xf32>
    %198 = vector.broadcast %197 : vector<8x1xf32> to vector<8x32xf32>
    %199 = arith.mulf %194, %198 : vector<8x32xf32>
    %200 = vector.broadcast %180 : vector<1x32xf32> to vector<8x32xf32>
    %201 = arith.mulf %199, %200 : vector<8x32xf32>
    %202 = vector.broadcast %181 : vector<1x32xf32> to vector<8x32xf32>
    %203 = arith.addf %201, %202 : vector<8x32xf32>
    %c0_50 = arith.constant 0 : index
    %c0_51 = arith.constant 0 : index
    %204 = vector.load %arg11[%c0_50, %c0_51] : memref<8x32xf32, #tpu.memory_space<vmem>>, vector<8x32xf32>
    tpu.vector_store %arg11[%c0_50, %c0_51], %203 {strides = array<i32>} : memref<8x32xf32, #tpu.memory_space<vmem>>, vector<8x32xf32>,
    return
  }
  func.func @transform_0(%arg0: i32) -> (i32, i32) {
    %c0_i32 = arith.constant 0 : i32
    %c0_i32_0 = arith.constant 0 : i32
    return %arg0, %c0_i32 : i32, i32
  }
  func.func @transform_1(%arg0: i32) -> (i32, i32) {
    %c0_i32 = arith.constant 0 : i32
    %c0_i32_0 = arith.constant 0 : i32
    return %arg0, %c0_i32 : i32, i32
  }
  func.func @transform_2(%arg0: i32) -> (i32, i32) {
    %c0_i32 = arith.constant 0 : i32
    %c0_i32_0 = arith.constant 0 : i32
    %c0_i32_1 = arith.constant 0 : i32
    return %c0_i32, %c0_i32_0 : i32, i32
  }
  func.func @transform_3(%arg0: i32) -> (i32, i32) {
    %c0_i32 = arith.constant 0 : i32
    %c0_i32_0 = arith.constant 0 : i32
    %c0_i32_1 = arith.constant 0 : i32
    return %c0_i32, %c0_i32_0 : i32, i32
  }
  func.func @transform_4(%arg0: i32) -> (i32, i32) {
    %c0_i32 = arith.constant 0 : i32
    %c0_i32_0 = arith.constant 0 : i32
    %c0_i32_1 = arith.constant 0 : i32
    return %c0_i32, %c0_i32_0 : i32, i32
  }
  func.func @transform_5(%arg0: i32) -> (i32, i32) {
    %c0_i32 = arith.constant 0 : i32
    %c0_i32_0 = arith.constant 0 : i32
    %c0_i32_1 = arith.constant 0 : i32
    return %c0_i32, %c0_i32_0 : i32, i32
  }
  func.func @transform_6(%arg0: i32) -> (i32, i32) {
    %c0_i32 = arith.constant 0 : i32
    %c0_i32_0 = arith.constant 0 : i32
    %c0_i32_1 = arith.constant 0 : i32
    return %c0_i32, %c0_i32_0 : i32, i32
  }
  func.func @transform_7(%arg0: i32) -> (i32, i32) {
    %c0_i32 = arith.constant 0 : i32
    %c0_i32_0 = arith.constant 0 : i32
    %c0_i32_1 = arith.constant 0 : i32
    return %c0_i32, %c0_i32_0 : i32, i32
  }
  func.func @transform_8(%arg0: i32) -> (i32, i32) {
    %c0_i32 = arith.constant 0 : i32
    %c0_i32_0 = arith.constant 0 : i32
    %c0_i32_1 = arith.constant 0 : i32
    return %c0_i32, %c0_i32_0 : i32, i32
  }
  func.func @transform_9(%arg0: i32) -> (i32, i32) {
    %c0_i32 = arith.constant 0 : i32
    %c0_i32_0 = arith.constant 0 : i32
    %c0_i32_1 = arith.constant 0 : i32
    return %c0_i32, %c0_i32_0 : i32, i32
  }
  func.func @transform_10(%arg0: i32) -> (i32, i32) {
    %c0_i32 = arith.constant 0 : i32
    %c0_i32_0 = arith.constant 0 : i32
    return %arg0, %c0_i32 : i32, i32
  }
}

</mosaic_0001>

<bundles_post_ra>
// kernel: tpu_custom_call.1
= control target key start
LH: loop header
LB: loop body
LE: loop exit
PB: predicated region body
PF: predicated region fallthrough
CT: control target
= control target key end

     0   :  { %s4124_s0 = inlined_call_operand.hbm [shape: f32[16,32], index: 0, kind: input, shape index: {}]   ;;  %s4125_s1 = inlined_call_operand.vmem [shape: f32[32,32], index: 1, kind: input, shape index: {}]   ;;  %s4126_s2 = inlined_call_operand.vmem [shape: f32[32,96], index: 2, kind: input, shape index: {}]   ;;  %s4127_s3 = inlined_call_operand.vmem [shape: f32[32,32], index: 3, kind: input, shape index: {}]   ;;  %s4128_s4 = inlined_call_operand.hbm [shape: f32[32,32], index: 4, kind: input, shape index: {}]   ;;  %s4129_s5 = inlined_call_operand.hbm [shape: f32[32,64], index: 5, kind: input, shape index: {}]   ;;  %s4130_s6 = inlined_call_operand.hbm [shape: f32[32,32], index: 6, kind: input, shape index: {}]   ;;  %s4131_s7 = inlined_call_operand.hbm [shape: f32[6,32], index: 7, kind: input, shape index: {}]   ;;  %s4132_s8 = inlined_call_operand.hbm [shape: f32[32,64], index: 8, kind: input, shape index: {}]   ;;  %s4133_s9 = inlined_call_operand.vmem [shape: f32[64,32], index: 9, kind: input, shape index: {}]   ;;  %s4134_s10 = inlined_call_operand.hbm [shape: f32[16,32], index: 10, kind: output, shape index: {}]  }
   0x1   :  { %4140 = sst [smem:[#allocation19_spill]] %s4128_s4 }
   0x2   :  { %4141 = sst [smem:[#allocation20_spill]] %s4133_s9 }
   0x3   :  { %4142 = sst [smem:[#allocation21_spill]] %s4134_s10 }
   0x4   :  { %15 = vsyncpa [#allocation3], 0 }
   0x5   :  { %17 = vsyncpa [#allocation3 + $0x1], 0 }
   0x6   :  { %18 = vsyncpa [#allocation6], 0 }
   0x7   :  { %19 = vsyncpa [#allocation9], 0 }
   0x8   :  { %20 = vsyncpa [#allocation12], 0 }
   0x9   :  { %21 = vsyncpa [#allocation4], 0 }
   0xa   :  { %23 = vsyncpa [#allocation4 + $0x1], 0  ;;  %s3539_s13 = smov 0   ;;  %s3541_s14 = smov 0  }
   0xb   :  { %s3543_s15 = smov 0   ;;  %s3545_s16 = smov 0  }
   0xc LB: > { %s3464_s17 = smov [#allocation5]   ;;  %s3560_s19 = sadd.s32 4294967295, %s3462_s16   ;;  %s3462_s16 = sphi %s3545_s16, %s4169_s16   ;;  %s3458_s15 = sphi %s3543_s15, %s4168_s15   ;;  %s3454_s14 = sphi %s3541_s14, %s4167_s14   ;;  %s3450_s13 = sphi %s3539_s13, %s4166_s13  }
   0xd   : > { %s298_s18 = sshll.u32 %s3464_s17, 4  ;;  %p2633_p0 = scmp.ge.s32.totalorder %s3462_s16, 1  ;;  %s3565_s18 = int_to_ptr.vmem [resolvable:$true] %s298_s18 }
   0xe   : > { %p4137_p1 = scmp.eq.s32.totalorder %s3560_s19, 0  ;;  %p280_p2 = scmp.lt.s32.totalorder %s3462_s16, 3 }
   0xf   : > { %s3465_s21 = smov [#allocation8]   ;;  %s3466_s24 = smov [#allocation7]  }
  0x10   : > { %p3567_p3 = pnand %p2633_p0, %p280_p2  ;;  %s324_s22 = sshll.u32 %s3465_s21, 4  ;;  %s3580_s22 = int_to_ptr.vmem [resolvable:$true] %s324_s22 }
  0x11   : > { %s311_s25 = sshll.u32 %s3466_s24, 4  ;;  %s4145_s4 = sld [smem:[#allocation19_spill]]  ;;  %s3582_s25 = int_to_ptr.vmem [resolvable:$true] %s311_s25 }
  0x12   : > { %s4143_s20 = scalar_select %p3567_p3, 1, 0 }
  0x13   : > { %p3055_p5 = pneg %p3567_p3 }
  0x15   : > { %p3576_p6 = pnand %p3055_p5, %p4137_p1 }
  0x17   : > { %s3214_s28 = scalar_lea.hbm %s4145_s4, 512  ;;  %p3592_p8 = pneg %p3576_p6 }
  0x18   : > { %p3215_p7 = scmp.ne.s32.totalorder %s4145_s4, %s3214_s28  ;;  %p3221_p11 = scmp.lt.u32.totalorder %s3214_s28, %s4145_s4 }
  0x1a   : > { %p3217_p9 = pnand %p3592_p8, %p3215_p7 }
  0x1c   : > { %p3218_p10 = pneg %p3217_p9 }
  0x1e   : > { %p3223_p12 = pnand %p3221_p11, %p3218_p10 }
  0x20   : > { %3226 = shalt.err (!%p3223_p12)
}
  0x21   : > { %s3227_s21 = scalar_lea.vmem %s3565_s18, 512  ;;  %p3235_p5 = scmp.lt.s32.totalorder %s3565_s18, %s3565_s18 }
  0x22   : > { %p3228_p13 = scmp.ne.s32.totalorder %s3565_s18, %s3227_s21  ;;  %p3236_p4 = scmp.lt.s32.totalorder %s3227_s21, %s3227_s21 }
  0x24   : > { %p3230_p0 = pnand %p3228_p13, %p3592_p8  ;;  %p3237_p7 = por %p3236_p4, %p3235_p5 }
  0x26   : > { %p3231_p2 = pneg %p3230_p0 }
  0x28   : > { %p3238_p9 = pnand %p3237_p7, %p3231_p2 }
  0x2a   : > { %3241 = shalt.err (!%p3238_p9)
}
  0x2b   : > { %s3467_s24 = smov 128   ;;  %s3468_s26 = smov 8  }
  0x2c   : > { %3058 = dma.hbm_to_vmem [thread:$0]  (!%p3576_p6), %s4145_s4, 512, %s3565_s18, [#allocation6], %s3467_s24, %s3467_s24, %s3468_s26  }
  0x2d   : > { %s3242_s12 = scalar_lea.hbm %s4130_s6, 512 }
  0x2e   : > { %p3243_p4 = scmp.ne.s32.totalorder %s4130_s6, %s3242_s12  ;;  %p3249_p12 = scmp.lt.u32.totalorder %s3242_s12, %s4130_s6 }
  0x30   : > { %p3245_p10 = pnand %p3243_p4, %p3592_p8 }
  0x32   : > { %p3246_p11 = pneg %p3245_p10 }
  0x34   : > { %p3251_p13 = pnand %p3249_p12, %p3246_p11 }
  0x36   : > { %3254 = shalt.err (!%p3251_p13)
}
  0x37   : > { %s3255_s18 = scalar_lea.vmem %s3580_s22, 512  ;;  %p3263_p7 = scmp.lt.s32.totalorder %s3580_s22, %s3580_s22 }
  0x38   : > { %p3256_p0 = scmp.ne.s32.totalorder %s3580_s22, %s3255_s18  ;;  %p3264_p9 = scmp.lt.s32.totalorder %s3255_s18, %s3255_s18 }
  0x3a   : > { %p3258_p2 = pnand %p3256_p0, %p3592_p8  ;;  %p3265_p4 = por %p3264_p9, %p3263_p7 }
  0x3c   : > { %p3259_p5 = pneg %p3258_p2 }
  0x3e   : > { %p3266_p10 = pnand %p3265_p4, %p3259_p5 }
  0x40   : > { %3269 = shalt.err (!%p3266_p10)
}
  0x41   : > { %3064 = dma.hbm_to_vmem [thread:$0]  (!%p3576_p6), %s4130_s6, 512, %s3580_s22, [#allocation9], %s3467_s24, %s3467_s24, %s3468_s26  }
  0x42   : > { %s3270_s29 = scalar_lea.hbm %s4129_s5, 512 }
  0x43   : > { %p3271_p11 = scmp.ne.s32.totalorder %s4129_s5, %s3270_s29  ;;  %p3277_p0 = scmp.lt.u32.totalorder %s3270_s29, %s4129_s5 }
  0x45   : > { %p3273_p12 = pnand %p3271_p11, %p3592_p8 }
  0x47   : > { %p3274_p13 = pneg %p3273_p12 }
  0x49   : > { %p3279_p2 = pnand %p3277_p0, %p3274_p13 }
  0x4b   : > { %3282 = shalt.err (!%p3279_p2)
}
  0x4c   : > { %s3283_s22 = scalar_lea.vmem %s3582_s25, 512  ;;  %p3291_p4 = scmp.lt.s32.totalorder %s3582_s25, %s3582_s25 }
  0x4d   : > { %p3284_p5 = scmp.ne.s32.totalorder %s3582_s25, %s3283_s22  ;;  %p3292_p10 = scmp.lt.s32.totalorder %s3283_s22, %s3283_s22 }
  0x4f   : > { %p3286_p7 = pnand %p3284_p5, %p3592_p8  ;;  %p3293_p11 = por %p3292_p10, %p3291_p4 }
  0x51   : > { %p3287_p9 = pneg %p3286_p7 }
  0x53   : > { %p3294_p12 = pnand %p3293_p11, %p3287_p9 }
  0x55   : > { %3297 = shalt.err (!%p3294_p12)
}
  0x56   : > { %3061 = dma.hbm_to_vmem [thread:$0]  (!%p3576_p6), %s4129_s5, 512, %s3582_s25, [#allocation6], %s3467_s24, %s3467_s24, %s3468_s26  }
  0x57   : > { %s3469_s10 = smov [#allocation10]   ;;  %s3470_s28 = smov [#allocation11]  }
  0x58   : > { %s338_s27 = sshll.u32 %s3469_s10, 4  ;;  %s348_s29 = sshll.u32 %s3470_s28, 4  ;;  %s339_s27 = int_to_ptr.vmem [resolvable:$true] %s338_s27  ;;  %s349_s29 = int_to_ptr.vmem [resolvable:$true] %s348_s29 }
  0x59   : > { %s3298_s17 = scalar_lea.hbm %s4131_s7, 128 }
  0x5a   : > { %p3299_p13 = scmp.ne.s32.totalorder %s4131_s7, %s3298_s17  ;;  %p3305_p5 = scmp.lt.u32.totalorder %s3298_s17, %s4131_s7 }
  0x5c   : > { %p3301_p0 = pnand %p3299_p13, %p3592_p8 }
  0x5e   : > { %p3302_p2 = pneg %p3301_p0 }
  0x60   : > { %p3307_p7 = pnand %p3305_p5, %p3302_p2 }
  0x62   : > { %3310 = shalt.err (!%p3307_p7)
}
  0x63   : > { %s3311_s25 = scalar_lea.vmem %s339_s27, 128  ;;  %p3319_p11 = scmp.lt.s32.totalorder %s339_s27, %s339_s27 }
  0x64   : > { %p3312_p9 = scmp.ne.s32.totalorder %s339_s27, %s3311_s25  ;;  %p3320_p12 = scmp.lt.s32.totalorder %s3311_s25, %s3311_s25 }
  0x66   : > { %p3314_p4 = pnand %p3312_p9, %p3592_p8  ;;  %p3321_p1 = por %p3320_p12, %p3319_p11 }
  0x68   : > { %p3315_p10 = pneg %p3314_p4 }
  0x6a   : > { %p3322_p3 = pnand %p3321_p1, %p3315_p10 }
  0x6c   : > { %3325 = shalt.err (!%p3322_p3)
}
  0x6d   : > { %3067 = dma.hbm_to_vmem [thread:$0]  (!%p3576_p6), %s4131_s7, 128, %s339_s27, [#allocation9]  }
  0x6e   : > { %s3326_s30 = scalar_lea.hbm %s4132_s8, 512 }
  0x6f   : > { %p3327_p13 = scmp.ne.s32.totalorder %s4132_s8, %s3326_s30  ;;  %p3333_p3 = scmp.lt.u32.totalorder %s3326_s30, %s4132_s8 }
  0x71   : > { %p3329_p0 = pnand %p3327_p13, %p3592_p8 }
  0x73   : > { %p3330_p1 = pneg %p3329_p0 }
  0x75   : > { %p3335_p2 = pnand %p3333_p3, %p3330_p1 }
  0x77   : > { %3338 = shalt.err (!%p3335_p2)
}
  0x78   : > { %s3339_s18 = scalar_lea.vmem %s349_s29, 512  ;;  %p3347_p4 = scmp.lt.s32.totalorder %s349_s29, %s349_s29 }
  0x79   : > { %p3340_p5 = scmp.ne.s32.totalorder %s349_s29, %s3339_s18  ;;  %p3348_p10 = scmp.lt.s32.totalorder %s3339_s18, %s3339_s18 }
  0x7b   : > { %p3342_p7 = pnand %p3340_p5, %p3592_p8  ;;  %p3349_p11 = por %p3348_p10, %p3347_p4 }
  0x7d   : > { %p3343_p9 = pneg %p3342_p7 }
  0x7f   : > { %p3350_p12 = pnand %p3349_p11, %p3343_p9 }
  0x81   : > { %3353 = shalt.err (!%p3350_p12)
}
  0x82   : > { %3070 = dma.hbm_to_vmem [thread:$0]  (!%p3576_p6), %s4132_s8, 512, %s349_s29, [#allocation12], %s3467_s24, %s3467_s24, %s3468_s26  }
  0x83   : > { %s2632_s23 = sadd.s32 4294967294, %s3462_s16   ;;  %s3709_s11 = sadd.s32 1, %s3462_s16  }
  0x84   : > { %s36_s9 = sadd.s32 1, %s3458_s15  ;;  %s33_s10 = ssub.s32 %s3462_s16, %s3709_s11 }
  0x85   : > { %p43_p8 = scmp.ne.s32.totalorder %s3458_s15, %s3454_s14  ;;  %p34_p13 = scmp.eq.s32.totalorder %s33_s10, 0 }
  0x86   : > { %p44_p0 = scmp.eq.s32.totalorder %s3462_s16, 0  ;;  %p49_p1 = scmp.ne.s32.totalorder %s3454_s14, %s3450_s13 }
  0x87   : > { %p267_p3 = scmp.eq.s32.totalorder %s3560_s19, 1  ;;  %p4147_p5 = scmp.eq.s32.totalorder %s3560_s19, 0 }
  0x88   : > { %s3721_s4 = scalar_select %p34_p13, %s3458_s15, %s36_s9  }
  0x89   : > { %p45_p2 = por %p44_p0, %p43_p8  ;;  %p3725_p7 = por %p4147_p5, %p49_p1 }
  0x8a   : > { %p3729_p6 = por %p267_p3, %p43_p8  ;;  %p273_p9 = scmp.eq.s32.totalorder %s2632_s23, 1 }
  0x8b   : > { %p3084_p4 = scmp.lt.s32.totalorder %s3462_s16, 2  ;;  %s365_s26 = sand.u32 1, %s3458_s15  }
  0x8c   : > { %s4149_s24 = scalar_select %p3729_p6, 1, 0 }
  0x8d   : > { %p3735_p10 = por %p273_p9, %p49_p1  ;;  %s2640_s30 = sshll.u32 %s365_s26, 3 }
  0x8e   : > { %s2641_s12 = sshll.u32 %s3462_s16, 7  ;;  %s369_s18 = scalar_lea.vmem [#allocation2], %s2640_s30 }
  0x8f   : > { %s4150_s29 = scalar_select %p3735_p10, 1, 0 }
  0x90   : > { %s3743_s22 = scalar_lea.hbm %s4124_s0, %s2641_s12  ;;  %s376_s27 = sshll.u32 %s369_s18, 4  ;;  %s3749_s27 = int_to_ptr.vmem [resolvable:$true] %s376_s27 }
  0x91   : > { %p3745_p11 = pnand %p3084_p4, %p45_p2  ;;  %s366_s23 = scalar_lea.sflag [#allocation3], %s365_s26 }
  0x92   : > { %s3354_s9 = scalar_lea.hbm %s3743_s22, 128  ;;  %s3359_s12 = scalar_lea.hbm %s4124_s0, 256 }
  0x93   : > { %p3355_p12 = scmp.ne.s32.totalorder %s3743_s22, %s3354_s9  ;;  %p3356_p8 = pneg %p3745_p11 }
  0x94   : > { %p3360_p1 = scmp.lt.u32.totalorder %s3743_s22, %s4124_s0  ;;  %p3361_p3 = scmp.lt.u32.totalorder %s3359_s12, %s3354_s9 }
  0x95   : > { %p3357_p13 = pnand %p3356_p8, %p3355_p12  ;;  %p3363_p5 = scmp.lt.u32.totalorder %s3354_s9, %s3743_s22 }
  0x96   : > { %p3362_p2 = por %p3361_p3, %p3360_p1 }
  0x97   : > { %p3358_p0 = pneg %p3357_p13 }
  0x98   : > { %p3364_p9 = por %p3363_p5, %p3362_p2 }
  0x9a   : > { %p3365_p4 = pnand %p3364_p9, %p3358_p0 }
  0x9c   : > { %3368 = shalt.err (!%p3365_p4)
}
  0x9d   : > { %s3369_s26 = scalar_lea.vmem %s3749_s27, 128  ;;  %s3471_s18 = smov [#allocation2]  }
  0x9e   : > { %p3370_p12 = scmp.ne.s32.totalorder %s3749_s27, %s3369_s26  ;;  %s3374_s10 = sshll.u32 %s3471_s18, 4  ;;  %s3375_s10 = int_to_ptr.vmem [resolvable:$false] %s3374_s10 }
  0x9f   : > { %s3376_s30 = scalar_lea.vmem %s3375_s10, 256  ;;  %p3377_p6 = scmp.lt.s32.totalorder %s3749_s27, %s3375_s10 }
  0xa0   : > { %p3372_p13 = pnand %p3370_p12, %p3356_p8  ;;  %p3378_p1 = scmp.lt.s32.totalorder %s3376_s30, %s3369_s26 }
  0xa2   : > { %p3373_p10 = pneg %p3372_p13  ;;  %p3379_p3 = por %p3378_p1, %p3377_p6 }
  0xa4   : > { %p3380_p2 = pnand %p3379_p3, %p3373_p10 }
  0xa6   : > { %3383 = shalt.err (!%p3380_p2)
}
  0xa7   : > { %3074 = dma.hbm_to_vmem [thread:$0]  (!%p3745_p11), %s3743_s22, 128, %s3749_s27, %s366_s23  }
  0xa8   : > { %p4152_p0 = scmp.ne.s32.totalorder %s4143_s20, 0 }
  0xa9   : > { %s3779_s9 = sand.u32 (!%p4152_p0), 1, %s3454_s14  }
  0xaa   : > { %394 = sbr.rel (%p4152_p0) target bundleno = 4503 (0x1197), region = 60  ;;  %s2643_s12 = sshll.u32 (!%p4152_p0), %s3779_s9, 3 }
  0xab   : > { %s397_s17 = scalar_lea.sflag (!%p4152_p0), [#allocation3], %s3779_s9  ;;  %s400_s21 = scalar_lea.vmem (!%p4152_p0), [#allocation2], %s2643_s12 }
  0xb1   : > { %3429 = dma.done.wait (%p3725_p7), %s397_s17, 128  }
  0xb2   : > { %3431 = vsyncadd (%p3725_p7), %s397_s17, 4294967168  ;;  %p4153_p6 = scmp.eq.s32.totalorder %s3560_s19, 0 }
  0xb4   : > { %3433 = dma.done.wait (%p4153_p6), [#allocation6], 1024   ;;  %p4154_p10 = pmov %p4153_p6 }
  0xb5   : > { %p4155_p11 = pmov %p4153_p6 }
  0xb6   : > { %3435 = vsyncadd (%p4154_p10), [#allocation6], 4294966272 }
  0xb7   : > { %3437 = dma.done.wait (%p4155_p11), [#allocation9], 640   ;;  %p4156_p8 = pmov %p4153_p6 }
  0xb8   : > { %p4157_p5 = pmov %p4153_p6 }
  0xb9   : > { %3439 = vsyncadd (%p4156_p8), [#allocation9], 4294966656 }
  0xba   : > { %3441 = dma.done.wait (%p4157_p5), [#allocation12], 512   ;;  %p4158_p9 = pmov %p4157_p5 }
  0xbb   : > { %v3472_v0 = vmov 0.0|0.0   ;;  %vm3473_vm0 = vmmov 0   ;;  %v3474_v1 = vmov 0.0   ;;  %v477_v2 = vld [vmem:[%s4126_s2] sm:$0xff]  ;;  %v478_v3 = vld [vmem:[%s4126_s2 + $0x8] sm:$0xff]  ;;  %v479_v4 = vld [vmem:[%s4126_s2 + $0x10] sm:$0xff]  ;;  %v472_v18 = vlaneseq }
  0xbc   : > { %3443 = vsyncadd (%p4158_p9), [#allocation12], 4294966784  ;;  %2953 = vmatprep.subr.bf16.mxu1 %v3472_v0  ;;  %2780 = vmatprep.mubr.msk.f32.mxu1 %vm3473_vm0, %v3474_v1  ;;  %v2954_v5 = vpack.c.bf16 %v478_v3, %v477_v2  ;;  %v480_v6 = vld [vmem:[%s4126_s2 + $0x18] sm:$0xff]  ;;  %v3820_v8 = vld [vmem:[%s400_s21] sm:$0xff]  ;;  %vm481_vm1 = vcmask 261120   ;;  %s3475_s10 = smov 104  }
  0xbd   : > { %2793 = vmatprep.subr.mxu0 %v3474_v1  ;;  %2795 = vmatprep.mubr.msk.f32.mxu0 %vm3473_vm0, %v3474_v1  ;;  %v2957_v7 = vpack.c.bf16 %v480_v6, %v479_v4  ;;  %s3476_s30 = smov 120   ;;  %s3477_s17 = smov 96   ;;  %vm568_vm2 = vcmask 64512   ;;  %v3862_v19 = vshrl.u32 %v472_v18, 7  ;;  %v475_v20 = vand.u32 127, %v472_v18  ;;  %v558_v18 = vld [vmem:[%s4127_s3 + $0x18] sm:$0xff] }
  0xbe   : > { %2955 = vmatpush3.bf16.msra.mxu1 %v2954_v5  ;;  %s3478_s21 = smov 112   ;;  %s3479_s20 = smov 64   ;;  %vm1238_vm4 = vcmask 130048   ;;  %vm1240_vm5 = vcmask 195584   ;;  %vm3943_vm6 = vmpackc.low %vm568_vm2, %vm568_vm2  ;;  %vm2389_vm7 = vcmask 523264  }
  0xbf   : > { %2956 = vmatprep.subr.bf16.mxu1 %v3472_v0  ;;  %vm476_vm3 = vcmp.le.s32.totalorder %v475_v20, %v3862_v19  ;;  %s3480_s28 = smov 8   ;;  %s3481_s22 = smov 24  }
  0xc0   : > { %s3482_s27 = smov 16   ;;  %s2650_s25 = sshll.u32 %s3560_s19, 1 }
  0xc1   : > { %p463_p7 = scmp.lt.s32.totalorder %s2650_s25, 3  ;;  %p4163_p12 = scmp.ne.s32.totalorder %s4149_s24, 0 }
  0xc2   : > { %2958 = vmatpush3.bf16.msra.mxu1 %v2957_v7 }
  0xc3   : > { %2783 = vmatprep.subr.mxu1 %v3474_v1  ;;  %s4171_s25 = smov (!%p463_p7, %s2650_s25), 3 }
  0xc4   : > { %s2651_s23 = sshll.u32 %s4171_s25, 3  ;;  %s461_s25 = scalar_lea.vmem [#allocation13], %s2643_s12 }
  0xc5   : > { %2781 = vmatmul.mubr.msk.f32.vlgmr.msra.gmra.mrb[0].mxu1 %vm481_vm1, %v3820_v8 }
  0xc6   : > { %2785 = vmatprep.mubr.msk.f32.mxu1 %vm3473_vm0, %v3474_v1 }
 0x198   : > { %v551_v9 = vpop.f32.mrb[0].mxu1 }
 0x199   : > { %564 = vrot.lane.b32.xlu1 %v551_v9, %s3475_s10  ;;  %560 = vrot.lane.b32.xlu0 %v551_v9, %s3476_s30  ;;  %v2782_v10 = vpop.f32.mrb[1].mxu1 }
 0x19d   : > { %566 = vrot.lane.b32.xlu1 %v551_v9, %s3477_s17  ;;  %562 = vrot.lane.b32.xlu0 %v551_v9, %s3478_s21 }
 0x20b   : > { %v3831_v11 = vpop.permute.xlu1 %564  ;;  %v561_v12 = vpop.permute.xlu0 %560 }
 0x20c   : > { %643 = vrot.lane.b32.xlu0 %v561_v12, %s3477_s17 }
 0x20f   : > { %v567_v13 = vpop.permute.xlu1 %566  ;;  %v3834_v14 = vpop.permute.xlu0 %562 }
 0x210   : > { %2784 = vmatpush3.xpose.msk.msra.mxu1 %vm568_vm2, %v567_v13  ;;  %795 = vrot.lane.b32.xlu0 %v3831_v11, %s3477_s17  ;;  %v556_v13 = vld [vmem:[%s4127_s3 + $0x8] sm:$0xff] }
 0x211   : > { %719 = vrot.lane.b32.xlu1 %v3834_v14, %s3477_s17  ;;  %2788 = vmatprep.subr.mxu1 %v3474_v1 }
 0x213   : > { %2786 = vmatmul.mubr.msk.f32.vlgmr.msra.gmra.mrb[2].mxu1 %vm568_vm2, %v551_v9 }
 0x214   : > { %2790 = vmatprep.mubr.msk.f32.mxu1 %vm3473_vm0, %v3474_v1 }
 0x27e   : > { %v644_v15 = vpop.permute.xlu0 %643 }
 0x27f   : > { %2789 = vmatpush3.xpose.msk.msra.mxu1 %vm568_vm2, %v644_v15 }
 0x280   : > { %2798 = vmatprep.subr.mxu1 %v3474_v1 }
 0x282   : > { %2791 = vmatmul.mubr.msk.f32.vlgmr.msra.gmra.mrb[4].mxu1 %vm568_vm2, %v561_v12  ;;  %v796_v16 = vpop.permute.xlu0 %795 }
 0x283   : > { %v720_v17 = vpop.permute.xlu1 %719  ;;  %2799 = vmatpush3.xpose.msk.msra.mxu1 %vm568_vm2, %v796_v16  ;;  %2800 = vmatprep.mubr.msk.f32.mxu1 %vm3473_vm0, %v3474_v1 }
 0x284   : > { %2794 = vmatpush3.xpose.msk.msra.mxu0 %vm568_vm2, %v720_v17  ;;  %2808 = vmatprep.subr.mxu1 %v3474_v1  ;;  %v557_v17 = vld [vmem:[%s4127_s3 + $0x10] sm:$0xff] }
 0x285   : > { %2803 = vmatprep.subr.mxu0 %v3474_v1  ;;  %v2963_v20 = vpack.c.bf16 %v558_v18, %v557_v17 }
 0x286   : > { %2801 = vmatmul.mubr.msk.f32.vlgmr.msra.gmra.mrb[6].mxu1 %vm568_vm2, %v3831_v11 }
 0x287   : > { %2796 = vmatmul.mubr.msk.f32.vlgmr.msra.gmra.mrb[0].mxu0 %vm568_vm2, %v3834_v14  ;;  %2810 = vmatprep.mubr.msk.f32.mxu1 %vm3473_vm0, %v3474_v1 }
 0x288   : > { %2805 = vmatprep.mubr.msk.f32.mxu0 %vm3473_vm0, %v3474_v1 }
 0x2e6   : > { %v639_v21 = vpop.f32.mrb[2].mxu1 }
 0x2e7   : > { %v873_v22 = vsel %vm476_vm3, %v639_v21, -1e+30  ;;  %v2787_v23 = vpop.f32.mrb[3].mxu1 }
 0x2e8   : > { %v877_v24 = vsel %vm568_vm2, %v873_v22, -inf }
 0x2e9   : > { %878 = vmax.xlane.f32.xlu1 %v877_v24 }
 0x355   : > { %v715_v25 = vpop.f32.mrb[4].mxu1 }
 0x356   : > { %v874_v26 = vsel %vm476_vm3, %v715_v25, -1e+30  ;;  %v2792_v27 = vpop.f32.mrb[5].mxu1 }
 0x357   : > { %v880_v28 = vsel %vm568_vm2, %v874_v26, -inf }
 0x358   : > { %881 = vmax.xlane.f32.xlu0 %v880_v28 }
 0x359   : > { %v867_v29 = vpop.f32.mrb[6].mxu1 }
 0x35a   : > { %v791_v30 = vpop.f32.mrb[0].mxu0  ;;  %v876_v31 = vsel %vm476_vm3, %v867_v29, -1e+30  ;;  %v2802_v32 = vpop.f32.mrb[7].mxu1 }
 0x35b   : > { %v875_v33 = vsel %vm476_vm3, %v791_v30, -1e+30  ;;  %v2797_v34 = vpop.f32.mrb[1].mxu0  ;;  %v886_v35 = vsel %vm568_vm2, %v876_v31, -inf }
 0x35c   : > { %v883_v36 = vsel %vm568_vm2, %v875_v33, -inf  ;;  %887 = vmax.xlane.f32.xlu1 %v886_v35 }
 0x35d   : > { %884 = vmax.xlane.f32.xlu0 %v883_v36 }
 0x36d   : > { %997 = vrot.lane.b32.xlu1 %v561_v12, %s3479_s20  ;;  %v555_v12 = vld [vmem:[%s4127_s3] sm:$0xff] }
 0x373   : > { %921 = vrot.lane.b32.xlu0 %v551_v9, %s3479_s20 }
 0x376   : > { %v879_v37 = vpop.xlane.xlu1 %878 }
 0x377   : > { %v889_v38 = vsub.f32 %v873_v22, %v879_v37  ;;  %v1417_v37 = vld [vmem:[#allocation7] sm:$0xff] }
 0x379   : > { %v893_v39 = vmul.f32 1.442695, %v889_v38  ;;  %v1418_v38 = vld [vmem:[#allocation7 + $0x8] sm:$0xff] }
 0x37b   : > { %3176 = vpow2.f32 %v893_v39  ;;  %v1419_v39 = vld [vmem:[#allocation7 + $0x10] sm:$0xff] }
 0x385   : > { %v3177_v40 = vpop.eup %3176 }
 0x386   : > { %v901_v41 = vsel %vm568_vm2, %v3177_v40, 0.0 }
 0x392   : > { %902 = vadd.xlane.f32.xlu0 %v901_v41  ;;  %v1420_v41 = vld [vmem:[#allocation7 + $0x18] sm:$0xff] }
 0x3e5   : > { %v882_v42 = vpop.xlane.xlu0 %881 }
 0x3e6   : > { %v890_v43 = vsub.f32 %v874_v26, %v882_v42  ;;  %v2975_v42 = vpack.c.bf16 %v1420_v41, %v1419_v39 }
 0x3e8   : > { %v895_v44 = vmul.f32 1.442695, %v890_v43 }
 0x3e9   : > { %v888_v45 = vpop.xlane.xlu1 %887 }
 0x3ea   : > { %3178 = vpow2.f32 %v895_v44  ;;  %v885_v46 = vpop.xlane.xlu0 %884  ;;  %v892_v47 = vsub.f32 %v876_v31, %v888_v45 }
 0x3eb   : > { %v891_v48 = vsub.f32 %v875_v33, %v885_v46 }
 0x3ec   : > { %v899_v49 = vmul.f32 1.442695, %v892_v47 }
 0x3ed   : > { %v897_v50 = vmul.f32 1.442695, %v891_v48  ;;  %v998_v51 = vpop.permute.xlu1 %997 }
 0x3ee   : > { %3180 = vpow2.f32 %v899_v49  ;;  %v922_v52 = vpop.permute.xlu0 %921  ;;  %2809 = vmatpush3.msra.mxu1 %v998_v51  ;;  %v1340_v49 = vld [vmem:[#allocation5] sm:$0xff] }
 0x3ef   : > { %3182 = vpow2.f32 %v897_v50  ;;  %2804 = vmatpush3.msra.mxu0 %v922_v52  ;;  %2818 = vmatprep.subr.mxu1 %v3474_v1  ;;  %v1341_v50 = vld [vmem:[#allocation5 + $0x8] sm:$0xff]  ;;  %v1342_v52 = vld [vmem:[#allocation5 + $0x10] sm:$0xff] }
 0x3f0   : > { %2813 = vmatprep.subr.mxu0 %v3474_v1  ;;  %v2966_v51 = vpack.c.bf16 %v1341_v50, %v1340_v49 }
 0x3f4   : > { %v3179_v53 = vpop.eup %3178 }
 0x3f5   : > { %v904_v54 = vsel %vm568_vm2, %v3179_v53, 0.0 }
 0x3f6   : > { %905 = vadd.xlane.f32.xlu1 %v904_v54 }
 0x3f8   : > { %v3181_v55 = vpop.eup %3180 }
 0x3f9   : > { %v3183_v56 = vpop.eup %3182  ;;  %v910_v57 = vsel %vm568_vm2, %v3181_v55, 0.0 }
 0x3fa   : > { %v907_v58 = vsel %vm568_vm2, %v3183_v56, 0.0  ;;  %911 = vadd.xlane.f32.xlu1 %v910_v57 }
 0x3fb   : > { %908 = vadd.xlane.f32.xlu0 %v907_v58  ;;  %v1332_v58 = vsub.s32 0, %v3862_v19 }
 0x40b   : > { %1073 = vrot.lane.b32.xlu1 %v3834_v14, %s3479_s20  ;;  %v2960_v14 = vpack.c.bf16 %v556_v13, %v555_v12 }
 0x411   : > { %1149 = vrot.lane.b32.xlu0 %v3831_v11, %s3479_s20  ;;  %s466_s20 = scalar_lea.vmem %s4125_s1, %s2651_s23  ;;  %s2502_s23 = sshll.u32 %s461_s25, 4  ;;  %s4081_s23 = int_to_ptr.vmem [resolvable:$true] %s2502_s23 }
 0x412   : > { %v469_v47 = vld [vmem:[%s466_s20] sm:$0xff]  ;;  %v470_v48 = vld [vmem:[%s466_s20 + $0x8] sm:$0xff]  ;;  %s4162_s20 = sld [smem:[#allocation21_spill]] }
 0x41f   : > { %v903_v59 = vpop.xlane.xlu0 %902 }
 0x420   : > { %3184 = vrcp.f32 %v903_v59  ;;  %v3930_v59 = vld [vmem:[#allocation10] sm:$0x3f] }
 0x42a   : > { %v3185_v60 = vpop.eup %3184 }
 0x42b   : > { %v917_v61 = vmul.f32 %v3185_v60, %v3177_v40  ;;  %v2971_v40 = vpack.c.bf16 %v1418_v38, %v1417_v37  ;;  %v1337_v60 = vsub.s32 1, %v3862_v19 }
 0x42d   : > { %2806 = vmatmul.mubr.msk.f32.vlgmr.msra.gmra.mrb[2].mxu0 %vm568_vm2, %v917_v61  ;;  %v1333_v61 = vrot.slane %v3930_v59, %v1332_v58 }
 0x42e   : > { %2815 = vmatprep.mubr.msk.f32.mxu0 %vm3473_vm0, %v3474_v1 }
 0x483   : > { %v906_v62 = vpop.xlane.xlu1 %905 }
 0x484   : > { %3186 = vrcp.f32 %v906_v62 }
 0x487   : > { %v912_v63 = vpop.xlane.xlu1 %911 }
 0x488   : > { %v909_v2 = vpop.xlane.xlu0 %908  ;;  %3188 = vrcp.f32 %v912_v63 }
 0x489   : > { %3190 = vrcp.f32 %v909_v2  ;;  %v1338_v2 = vrot.slane %v3930_v59, %v1337_v60 }
 0x48b   : > { %v1074_v3 = vpop.permute.xlu1 %1073 }
 0x48c   : > { %2814 = vmatpush3.msra.mxu0 %v1074_v3  ;;  %v1150_v6 = vpop.permute.xlu0 %1149 }
 0x48d   : > { %2959 = vmatprep.subr.bf16.mxu0 %v3472_v0 }
 0x48e   : > { %v3187_v4 = vpop.eup %3186 }
 0x48f   : > { %v918_v5 = vmul.f32 %v3187_v4, %v3179_v53  ;;  %v1343_v53 = vld [vmem:[#allocation5 + $0x18] sm:$0xff] }
 0x490   : > { %v2969_v54 = vpack.c.bf16 %v1343_v53, %v1342_v52 }
 0x491   : > { %2811 = vmatmul.mubr.msk.f32.vlgmr.msra.gmra.mrb[8].mxu1 %vm568_vm2, %v918_v5 }
 0x492   : > { %v3189_v7 = vpop.eup %3188  ;;  %2819 = vmatpush3.msra.mxu1 %v1150_v6  ;;  %2820 = vmatprep.mubr.msk.f32.mxu1 %vm3473_vm0, %v3474_v1 }
 0x493   : > { %v3191_v9 = vpop.eup %3190  ;;  %v920_v10 = vmul.f32 %v3189_v7, %v3181_v55  ;;  %2965 = vmatprep.subr.bf16.mxu1 %v3472_v0 }
 0x494   : > { %v919_v11 = vmul.f32 %v3191_v9, %v3183_v56 }
 0x495   : > { %2821 = vmatmul.mubr.msk.f32.vlgmr.msra.gmra.mrb[10].mxu1 %vm568_vm2, %v920_v10 }
 0x496   : > { %2816 = vmatmul.mubr.msk.f32.vlgmr.msra.gmra.mrb[4].mxu0 %vm568_vm2, %v919_v11  ;;  %2842 = vmatprep.mubr.msk.f32.mxu1 %vm3473_vm0, %v3474_v1 }
 0x497   : > { %2831 = vmatprep.mubr.msk.f32.mxu0 %vm3473_vm0, %v3474_v1  ;;  %2961 = vmatpush3.bf16.msra.mxu0 %v2960_v14 }
 0x498   : > { %2962 = vmatprep.subr.bf16.mxu0 %v3472_v0  ;;  %2967 = vmatpush3.bf16.msra.mxu1 %v2966_v51 }
 0x499   : > { %2968 = vmatprep.subr.bf16.mxu1 %v3472_v0 }
 0x49b   : > { %2964 = vmatpush3.bf16.msra.mxu0 %v2963_v20 }
 0x49c   : > { %2972 = vmatprep.subr.bf16.mxu0 %v2971_v40  ;;  %2970 = vmatpush3.bf16.msra.mxu1 %v2969_v54 }
 0x49d   : > { %2979 = vmatprep.subr.bf16.mxu1 %v3472_v0 }
 0x500   : > { %v993_v15 = vpop.f32.mrb[2].mxu0 }
 0x501   : > { %v2807_v16 = vpop.f32.mrb[3].mxu0 }
 0x564   : > { %v1069_v21 = vpop.f32.mrb[8].mxu1 }
 0x565   : > { %1226 = vrot.lane.b32.xlu1 %v1069_v21, %s3480_s28  ;;  %v2812_v22 = vpop.f32.mrb[9].mxu1 }
 0x568   : > { %v1221_v23 = vpop.f32.mrb[10].mxu1 }
 0x569   : > { %v1145_v24 = vpop.f32.mrb[4].mxu0  ;;  %1234 = vrot.lane.b32.xlu1 %v1221_v23, %s3481_s22  ;;  %v2822_v25 = vpop.f32.mrb[11].mxu1 }
 0x56a   : > { %1230 = vrot.lane.b32.xlu0 %v1145_v24, %s3482_s27  ;;  %v2817_v26 = vpop.f32.mrb[5].mxu0 }
 0x5d7   : > { %v1227_v27 = vpop.permute.xlu1 %1226 }
 0x5d8   : > { %v1237_v29 = vsel %vm568_vm2, %v993_v15, %v1227_v27 }
 0x5db   : > { %v1235_v28 = vpop.permute.xlu1 %1234 }
 0x5dc   : > { %v1231_v30 = vpop.permute.xlu0 %1230 }
 0x5dd   : > { %v1239_v31 = vsel %vm1238_vm4, %v1237_v29, %v1231_v30 }
 0x5de   : > { %v1241_v32 = vsel %vm1240_vm5, %v1239_v31, %v1235_v28 }
 0x5df   : > { %2832 = vmatmul.mubr.msk.f32.vlgmr.msra.gmra.mrb[6].mxu0 %vm481_vm1, %v1241_v32 }
 0x5e0   : > { %2974 = vmatpush3.bf16.msra.mxu0 %v2971_v40  ;;  %2853 = vmatprep.mubr.msk.f32.mxu0 %vm481_vm1, %v469_v47 }
 0x5e1   : > { %2976 = vmatprep.subr.bf16.mxu0 %v2975_v42 }
 0x5e4   : > { %2978 = vmatpush3.bf16.msra.mxu0 %v2975_v42 }
 0x5e5   : > { %2983 = vmatprep.subr.bf16.mxu0 %v3472_v0 }
 0x5e7   : > { %2854 = vmatmul.mubr.msk.f32.vlgmr.msra.gmra.mrb[8].mxu0 %vm481_vm1, %v470_v48 }
 0x5e8   : > { %2867 = vmatprep.mubr.msk.f32.mxu0 %vm3473_vm0, %v3474_v1 }
 0x6b2   : > { %v1311_v33 = vpop.f32.mrb[6].mxu0 }
 0x6b3   : > { %v1315_v34 = vadd.f32 %v1311_v33, %v3820_v8  ;;  %v2833_v35 = vpop.f32.mrb[7].mxu0 }
 0x6b5   : > { %v1316_v36 = vsel %vm481_vm1, %v1315_v34, 0.0 }
 0x6b6   : > { %1317 = vadd.xlane.f32.xlu0 %v1316_v36 }
 0x6ba   : > { %v2855_v5 = vpop.f32.mrb[8].mxu0 }
 0x6bb   : > { %v1493_v6 = vpop.f32.mrb[9].mxu0 }
 0x6bc   : > { %v2980_v7 = vpack.c.bf16 %v2855_v5, %v1493_v6  ;;  %v3141_v9 = vpack.i.bf16 %v2855_v5, %v1493_v6 }
 0x6cc   : > { %3142 = vrot.lane.b32.xlu0 %v3141_v9, %s3476_s30 }
 0x6d0   : > { %3152 = vrot.lane.b32.xlu0 %v3141_v9, %s3475_s10 }
 0x743   : > { %v1318_v43 = vpop.xlane.xlu0 %1317 }
 0x744   : > { %v1320_v44 = vmul.f32 0.03125, %v1318_v43 }
 0x746   : > { %v1321_v8 = vsub.f32 %v1315_v34, %v1320_v44 }
 0x747   : > { %v3953_v11 = vpop.permute.xlu0 %3142 }
 0x748   : > { %v1322_v45 = vmul.f32 %v1321_v8, %v1321_v8  ;;  %v3145_v13 = vunpack.i.h.bf16 %v3953_v11  ;;  %v3144_v14 = vunpack.i.l.bf16 %v3953_v11 }
 0x74a   : > { %v1323_v46 = vsel %vm481_vm1, %v1322_v45, 0.0  ;;  %v2984_v17 = vpack.c.bf16 %v3145_v13, %v3144_v14 }
 0x74b   : > { %1324 = vadd.xlane.f32.xlu1 %v1323_v46  ;;  %v3961_v18 = vpop.permute.xlu0 %3152 }
 0x74c   : > { %v3155_v20 = vunpack.i.h.bf16 %v3961_v18  ;;  %v3154_v21 = vunpack.i.l.bf16 %v3961_v18  ;;  %2986 = vmatpush3.bf16.xpose.msk.msra.mxu0 %vm3943_vm6, %v2984_v17 }
 0x74d   : > { %2991 = vmatprep.subr.bf16.mxu0 %v3472_v0 }
 0x74e   : > { %v2992_v25 = vpack.c.bf16 %v3155_v20, %v3154_v21 }
 0x75c   : > { %3147 = vrot.lane.b32.xlu1 %v3141_v9, %s3478_s21 }
 0x7d8   : > { %v1325_v55 = vpop.xlane.xlu1 %1324 }
 0x7d9   : > { %v1326_v56 = vmul.f32 0.03125, %v1325_v55 }
 0x7db   : > { %v1327_v57 = vadd.f32 1e-05, %v1326_v56 }
 0x7dc   : > { %v3955_v12 = vpop.permute.xlu1 %3147 }
 0x7dd   : > { %3192 = vrsqrt.f32 %v1327_v57  ;;  %v3150_v15 = vunpack.i.h.bf16 %v3955_v12  ;;  %v3149_v16 = vunpack.i.l.bf16 %v3955_v12 }
 0x7df   : > { %v2988_v22 = vpack.c.bf16 %v3150_v15, %v3149_v16 }
 0x7e7   : > { %v3193_v62 = vpop.eup %3192 }
 0x7e8   : > { %v1329_v63 = vmul.f32 %v3193_v62, %v1321_v8 }
 0x7ea   : > { %v1334_v3 = vmul.f32 %v1333_v61, %v1329_v63 }
 0x7ec   : > { %v3935_v4 = vadd.f32 %v1338_v2, %v1334_v3 }
 0x7ee   : > { %2843 = vmatmul.mubr.msk.f32.vlgmr.msra.gmra.mrb[12].mxu1 %vm481_vm1, %v3935_v4 }
 0x7ef   : > { %2860 = vmatprep.mubr.msk.f32.mxu1 %vm3473_vm0, %v3474_v1  ;;  %2982 = vmatpush3.bf16.xpose.msk.msra.mxu1 %vm3943_vm6, %v2980_v7 }
 0x7f0   : > { %2987 = vmatprep.subr.bf16.mxu1 %v3472_v0 }
 0x8c1   : > { %v1413_v23 = vpop.f32.mrb[12].mxu1 }
 0x8c2   : > { %1509 = vrot.lane.b32.xlu0 %v1413_v23, %s3478_s21  ;;  %1507 = vrot.lane.b32.xlu1 %v1413_v23, %s3476_s30  ;;  %v2844_v24 = vpop.f32.mrb[13].mxu1  ;;  %s2489_s30 = scalar_lea.sflag [#allocation4], %s3779_s9  ;;  %s3384_s21 = scalar_lea.vmem %s4081_s23, 128 }
 0x8c3   : > { %2861 = vmatmul.mubr.msk.f32.vlgmr.msra.gmra.mrb[14].mxu1 %vm568_vm2, %v1413_v23  ;;  %p3385_p4 = scmp.ne.s32.totalorder %s4081_s23, %s3384_s21 }
 0x8c4   : > { %2990 = vmatpush3.bf16.xpose.msk.msra.mxu1 %vm3943_vm6, %v2988_v22  ;;  %2874 = vmatprep.mubr.msk.f32.mxu1 %vm3473_vm0, %v3474_v1 }
 0x8c5   : > { %2995 = vmatprep.subr.bf16.mxu1 %v3472_v0  ;;  %p3386_p13 = pnand %p3385_p4, %p4163_p12 }
 0x8c6   : > { %1511 = vrot.lane.b32.xlu1 %v1413_v23, %s3475_s10 }
 0x8c7   : > { %p3387_p1 = pneg %p3386_p13 }
 0x934   : > { %v1510_v26 = vpop.permute.xlu0 %1509  ;;  %v1508_v27 = vpop.permute.xlu1 %1507 }
 0x935   : > { %2868 = vmatmul.mubr.msk.f32.vlgmr.msra.gmra.mrb[10].mxu0 %vm568_vm2, %v1508_v27  ;;  %2875 = vmatmul.mubr.msk.f32.vlgmr.msra.gmra.mrb[16].mxu1 %vm568_vm2, %v1510_v26 }
 0x936   : > { %2994 = vmatpush3.bf16.xpose.msk.msra.mxu0 %vm3943_vm6, %v2992_v25  ;;  %2881 = vmatprep.mubr.msk.f32.mxu0 %vm3473_vm0, %v3474_v1 }
 0x937   : > { %2888 = vmatprep.mubr.msk.f32.mxu1 %vm3473_vm0, %v3474_v1  ;;  %3001 = vmatprep.subr.bf16.mxu0 %v3472_v0 }
 0x938   : > { %v1512_v28 = vpop.permute.xlu1 %1511 }
 0x93d   : > { %2882 = vmatmul.mubr.msk.f32.vlgmr.msra.gmra.mrb[12].mxu0 %vm568_vm2, %v1512_v28 }
 0x93e   : > { %2902 = vmatprep.mubr.msk.f32.mxu0 %vm3473_vm0, %v3474_v1 }
 0x996   : > { %v1599_v29 = vpop.f32.mrb[14].mxu1 }
 0x997   : > { %v2862_v30 = vpop.f32.mrb[15].mxu1  ;;  %v1831_v31 = vsel %vm1238_vm4, %v1599_v29, -inf }
 0x998   : > { %1832 = vmax.xlane.f32.xlu0 %v1831_v31 }
 0xa08   : > { %v1675_v32 = vpop.f32.mrb[10].mxu0  ;;  %v1751_v33 = vpop.f32.mrb[16].mxu1 }
 0xa09   : > { %v2869_v34 = vpop.f32.mrb[11].mxu0  ;;  %v2876_v35 = vpop.f32.mrb[17].mxu1  ;;  %v1834_v36 = vsel %vm1238_vm4, %v1675_v32, -inf  ;;  %v1837_v37 = vsel %vm1238_vm4, %v1751_v33, -inf }
 0xa0a   : > { %1835 = vmax.xlane.f32.xlu1 %v1834_v36  ;;  %1838 = vmax.xlane.f32.xlu0 %v1837_v37  ;;  %v1504_v35 = vld [vmem:[#allocation8 + $0x10] sm:$0xff]  ;;  %v1505_v36 = vld [vmem:[#allocation8 + $0x18] sm:$0xff] }
 0xa0b   : > { %v3011_v37 = vpack.c.bf16 %v1505_v36, %v1504_v35 }
 0xa10   : > { %v1827_v38 = vpop.f32.mrb[12].mxu0 }
 0xa11   : > { %v2883_v39 = vpop.f32.mrb[13].mxu0  ;;  %v1840_v40 = vsel %vm1238_vm4, %v1827_v38, -inf }
 0xa12   : > { %1841 = vmax.xlane.f32.xlu0 %v1840_v40 }
 0xa1b   : > { %3157 = vrot.lane.b32.xlu1 %v3141_v9, %s3477_s17 }
 0xa25   : > { %v1833_v41 = vpop.xlane.xlu0 %1832 }
 0xa26   : > { %v1843_v42 = vsub.f32 %v1599_v29, %v1833_v41 }
 0xa28   : > { %v1847_v43 = vmul.f32 1.442695, %v1843_v42 }
 0xa2a   : > { %3194 = vpow2.f32 %v1847_v43 }
 0xa34   : > { %v3195_v44 = vpop.eup %3194 }
 0xa35   : > { %v1855_v8 = vsel %vm1238_vm4, %v3195_v44, 0.0 }
 0xa3f   : > { %1856 = vadd.xlane.f32.xlu1 %v1855_v8 }
 0xa97   : > { %v1836_v45 = vpop.xlane.xlu1 %1835  ;;  %v1839_v46 = vpop.xlane.xlu0 %1838 }
 0xa98   : > { %v1844_v47 = vsub.f32 %v1675_v32, %v1836_v45  ;;  %v1845_v48 = vsub.f32 %v1751_v33, %v1839_v46  ;;  %v1502_v32 = vld [vmem:[#allocation8] sm:$0xff]  ;;  %v1503_v33 = vld [vmem:[#allocation8 + $0x8] sm:$0xff] }
 0xa99   : > { %v3008_v34 = vpack.c.bf16 %v1503_v33, %v1502_v32 }
 0xa9a   : > { %v1849_v49 = vmul.f32 1.442695, %v1844_v47  ;;  %v1851_v50 = vmul.f32 1.442695, %v1845_v48 }
 0xa9b   : > { %v3158_v51 = vpop.permute.xlu1 %3157 }
 0xa9c   : > { %3196 = vpow2.f32 %v1849_v49  ;;  %v3160_v52 = vunpack.i.h.bf16 %v3158_v51  ;;  %v3159_v53 = vunpack.i.l.bf16 %v3158_v51 }
 0xa9d   : > { %3198 = vpow2.f32 %v1851_v50 }
 0xa9e   : > { %v2996_v54 = vpack.c.bf16 %v3160_v52, %v3159_v53 }
 0xa9f   : > { %v1842_v55 = vpop.xlane.xlu0 %1841 }
 0xaa0   : > { %v1846_v56 = vsub.f32 %v1827_v38, %v1842_v55  ;;  %2997 = vmatpush3.bf16.msra.mxu1 %v2996_v54 }
 0xaa1   : > { %2998 = vmatprep.subr.bf16.mxu1 %v3472_v0 }
 0xaa2   : > { %v1853_v57 = vmul.f32 1.442695, %v1846_v56 }
 0xaa4   : > { %3200 = vpow2.f32 %v1853_v57 }
 0xaa6   : > { %v3197_v58 = vpop.eup %3196 }
 0xaa7   : > { %v3199_v60 = vpop.eup %3198  ;;  %v1858_v61 = vsel %vm1238_vm4, %v3197_v58, 0.0 }
 0xaa8   : > { %1859 = vadd.xlane.f32.xlu0 %v1858_v61  ;;  %v1861_v62 = vsel %vm1238_vm4, %v3199_v60, 0.0 }
 0xaa9   : > { %1862 = vadd.xlane.f32.xlu1 %v1861_v62  ;;  %v2306_v62 = vld [vmem:[#allocation11 + $0x18] sm:$0xff] }
 0xaae   : > { %v3201_v63 = vpop.eup %3200 }
 0xaaf   : > { %v1864_v2 = vsel %vm1238_vm4, %v3201_v63, 0.0 }
 0xab0   : > { %1865 = vadd.xlane.f32.xlu0 %v1864_v2 }
 0xaba   : > { %3167 = vrot.lane.b32.xlu1 %v3955_v12, %s3477_s17 }
 0xabe   : > { %3172 = vrot.lane.b32.xlu1 %v3961_v18, %s3477_s17 }
 0xac6   : > { %3162 = vrot.lane.b32.xlu0 %v3953_v11, %s3477_s17  ;;  %s4161_s17 = sld [smem:[#allocation20_spill]] }
 0xacc   : > { %v1857_v3 = vpop.xlane.xlu1 %1856  ;;  %v2382_v2 = vld [vmem:[%s4161_s17 + $0x8] sm:$0xff] }
 0xacd   : > { %3202 = vrcp.f32 %v1857_v3  ;;  %v2383_v3 = vld [vmem:[%s4161_s17 + $0x10] sm:$0xff] }
 0xad7   : > { %v3203_v5 = vpop.eup %3202 }
 0xad8   : > { %v1871_v6 = vmul.f32 %v3203_v5, %v3195_v44 }
 0xada   : > { %2889 = vmatmul.mubr.msk.f32.vlgmr.msra.gmra.mrb[18].mxu1 %vm1238_vm4, %v1871_v6  ;;  %v2384_v6 = vld [vmem:[%s4161_s17 + $0x18] sm:$0xff] }
 0xadb   : > { %2895 = vmatprep.mubr.msk.f32.mxu1 %vm3473_vm0, %v3474_v1 }
 0xb35   : > { %v1860_v9 = vpop.xlane.xlu0 %1859 }
 0xb36   : > { %v1863_v7 = vpop.xlane.xlu1 %1862 }
 0xb37   : > { %3204 = vrcp.f32 %v1863_v7  ;;  %v3023_v7 = vpack.c.bf16 %v2384_v6, %v2383_v3 }
 0xb38   : > { %3206 = vrcp.f32 %v1860_v9  ;;  %v2385_v9 = vld [vmem:[%s4161_s17 + $0x20] sm:$0xff] }
 0xb3a   : > { %v3168_v10 = vpop.permute.xlu1 %3167 }
 0xb3b   : > { %v3170_v12 = vunpack.i.h.bf16 %v3168_v10  ;;  %v3169_v13 = vunpack.i.l.bf16 %v3168_v10  ;;  %v2386_v10 = vld [vmem:[%s4161_s17 + $0x28] sm:$0xff] }
 0xb3d   : > { %v3002_v14 = vpack.c.bf16 %v3170_v12, %v3169_v13  ;;  %v1866_v15 = vpop.xlane.xlu0 %1865  ;;  %v3026_v12 = vpack.c.bf16 %v2386_v10, %v2385_v9 }
 0xb3e   : > { %3208 = vrcp.f32 %v1866_v15  ;;  %v3173_v16 = vpop.permute.xlu1 %3172 }
 0xb3f   : > { %3003 = vmatpush3.bf16.msra.mxu0 %v3002_v14  ;;  %v3175_v23 = vunpack.i.h.bf16 %v3173_v16  ;;  %v3174_v24 = vunpack.i.l.bf16 %v3173_v16  ;;  %v2300_v16 = vsub.s32 3, %v3862_v19 }
 0xb40   : > { %3007 = vmatprep.subr.bf16.mxu0 %v3472_v0 }
 0xb41   : > { %v3205_v11 = vpop.eup %3204  ;;  %v3163_v17 = vpop.permute.xlu0 %3162  ;;  %v3005_v28 = vpack.c.bf16 %v3175_v23, %v3174_v24  ;;  %v2388_v24 = vld [vmem:[%s4161_s17 + $0x38] sm:$0xff] }
 0xb42   : > { %v1873_v18 = vmul.f32 %v3205_v11, %v3199_v60  ;;  %v3165_v20 = vunpack.i.h.bf16 %v3163_v17  ;;  %v3164_v21 = vunpack.i.l.bf16 %v3163_v17  ;;  %v3207_v22 = vpop.eup %3206  ;;  %v2304_v60 = vld [vmem:[#allocation11 + $0x8] sm:$0xff]  ;;  %v2295_v11 = vsub.s32 2, %v3862_v19 }
 0xb43   : > { %v1872_v26 = vmul.f32 %v3207_v22, %v3197_v58  ;;  %v2303_v58 = vld [vmem:[#allocation11] sm:$0xff] }
 0xb44   : > { %v2999_v25 = vpack.c.bf16 %v3165_v20, %v3164_v21  ;;  %2903 = vmatmul.mubr.msk.f32.vlgmr.msra.gmra.mrb[14].mxu0 %vm1238_vm4, %v1873_v18  ;;  %v3014_v61 = vpack.c.bf16 %v2304_v60, %v2303_v58  ;;  %v2296_v17 = vrot.slane %v3930_v59, %v2295_v11  ;;  %v2301_v21 = vrot.slane %v3930_v59, %v2300_v16 }
 0xb45   : > { %2920 = vmatprep.mubr.msk.f32.mxu0 %vm3473_vm0, %v3474_v1  ;;  %3009 = vmatpush3.bf16.msra.mxu0 %v3008_v34 }
 0xb46   : > { %3000 = vmatpush3.bf16.msra.mxu1 %v2999_v25  ;;  %3010 = vmatprep.subr.bf16.mxu0 %v3472_v0 }
 0xb47   : > { %3004 = vmatprep.subr.bf16.mxu1 %v3472_v0 }
 0xb48   : > { %v3209_v27 = vpop.eup %3208 }
 0xb49   : > { %2896 = vmatmul.mubr.msk.f32.vlgmr.msra.gmra.mrb[20].mxu1 %vm1238_vm4, %v1872_v26  ;;  %v1874_v29 = vmul.f32 %v3209_v27, %v3201_v63  ;;  %3012 = vmatpush3.bf16.msra.mxu0 %v3011_v37  ;;  %v2381_v63 = vld [vmem:[%s4161_s17] sm:$0xff] }
 0xb4a   : > { %3006 = vmatpush3.bf16.msra.mxu1 %v3005_v28  ;;  %2909 = vmatprep.mubr.msk.f32.mxu1 %vm3473_vm0, %v3474_v1  ;;  %v3020_v5 = vpack.c.bf16 %v2382_v2, %v2381_v63 }
 0xb4b   : > { %3013 = vmatprep.subr.bf16.mxu1 %v3472_v0  ;;  %3019 = vmatprep.subr.bf16.mxu0 %v3472_v0 }
 0xb4d   : > { %2910 = vmatmul.mubr.msk.f32.vlgmr.msra.gmra.mrb[22].mxu1 %vm1238_vm4, %v1874_v29 }
 0xb4e   : > { %2931 = vmatprep.mubr.msk.f32.mxu1 %vm3473_vm0, %v3474_v1  ;;  %3015 = vmatpush3.bf16.msra.mxu1 %v3014_v61 }
 0xb4f   : > { %3016 = vmatprep.subr.bf16.mxu1 %v3472_v0 }
 0xbad   : > { %v1950_v30 = vpop.f32.mrb[18].mxu1 }
 0xbae   : > { %v2890_v31 = vpop.f32.mrb[19].mxu1 }
 0xc17   : > { %v2108_v38 = vpop.f32.mrb[14].mxu0 }
 0xc18   : > { %2196 = vrot.lane.b32.xlu1 %v2108_v38, %s3482_s27  ;;  %v2904_v39 = vpop.f32.mrb[15].mxu0  ;;  %s2689_s27 = sshll.u32 %s3560_s19, 7  ;;  %s3483_s19 = smov [#allocation13]  }
 0xc19   : > { %s4079_s10 = scalar_lea.hbm %s4162_s20, %s2689_s27  ;;  %s3388_s12 = sshll.u32 %s3483_s19, 4  ;;  %s3389_s12 = int_to_ptr.vmem [resolvable:$false] %s3388_s12 }
 0xc1a   : > { %p3391_p3 = scmp.lt.s32.totalorder %s4081_s23, %s3389_s12 }
 0xc1c   : > { %v2029_v40 = vpop.f32.mrb[20].mxu1 }
 0xc1d   : > { %2192 = vrot.lane.b32.xlu0 %v2029_v40, %s3480_s28  ;;  %v2897_v41 = vpop.f32.mrb[21].mxu1  ;;  %s3390_s28 = scalar_lea.vmem %s3389_s12, 256 }
 0xc1e   : > { %v2479_v41 = vsub.s32 4, %v3862_v19  ;;  %p3392_p2 = scmp.lt.s32.totalorder %s3390_s28, %s3384_s21 }
 0xc20   : > { %v2187_v42 = vpop.f32.mrb[22].mxu1  ;;  %p3393_p0 = por %p3392_p2, %p3391_p3 }
 0xc21   : > { %2200 = vrot.lane.b32.xlu0 %v2187_v42, %s3481_s22  ;;  %v2911_v43 = vpop.f32.mrb[23].mxu1  ;;  %v2484_v42 = vsub.s32 5, %v3862_v19 }
 0xc22   : > { %v2480_v43 = vrot.slane %v3930_v59, %v2479_v41  ;;  %p3394_p6 = pnand %p3393_p0, %p3387_p1 }
 0xc8a   : > { %v2197_v45 = vpop.permute.xlu1 %2196 }
 0xc8f   : > { %v2193_v44 = vpop.permute.xlu0 %2192 }
 0xc90   : > { %v2203_v8 = vsel %vm568_vm2, %v1950_v30, %v2193_v44 }
 0xc91   : > { %v2204_v46 = vsel %vm1238_vm4, %v2203_v8, %v2197_v45  ;;  %v2485_v45 = vrot.slane %v3930_v59, %v2484_v42 }
 0xc93   : > { %v2201_v47 = vpop.permute.xlu0 %2200 }
 0xc94   : > { %v2205_v48 = vsel %vm1240_vm5, %v2204_v46, %v2201_v47 }
 0xc95   : > { %2921 = vmatmul.mubr.msk.f32.vlgmr.msra.gmra.mrb[16].mxu0 %vm481_vm1, %v2205_v48 }
 0xc96   : > { %2950 = vmatprep.mubr.msk.f32.mxu0 %vm3473_vm0, %v3474_v1  ;;  %v2305_v1 = vld [vmem:[#allocation11 + $0x10] sm:$0xff]  ;;  %3021 = vmatpush3.bf16.msra.mxu0 %v3020_v5 }
 0xc97   : > { %3022 = vmatprep.subr.bf16.mxu0 %v3472_v0 }
 0xc9a   : > { %3024 = vmatpush3.bf16.msra.mxu0 %v3023_v7 }
 0xc9b   : > { %3025 = vmatprep.subr.bf16.mxu0 %v3472_v0 }
 0xc9e   : > { %3027 = vmatpush3.bf16.msra.mxu0 %v3026_v12 }
 0xc9f   : > { %3028 = vmatprep.subr.bf16.mxu0 %v3472_v0  ;;  %v2387_v0 = vld [vmem:[%s4161_s17 + $0x30] sm:$0xff] }
 0xca0   : > { %v3029_v25 = vpack.c.bf16 %v2388_v24, %v2387_v0 }
 0xca2   : > { %3030 = vmatpush3.bf16.msra.mxu0 %v3029_v25 }
 0xd68   : > { %v2275_v49 = vpop.f32.mrb[16].mxu0 }
 0xd69   : > { %v2279_v50 = vadd.f32 %v2275_v49, %v3935_v4  ;;  %v2922_v51 = vpop.f32.mrb[17].mxu0  ;;  %v3017_v4 = vpack.c.bf16 %v2306_v62, %v2305_v1 }
 0xd6b   : > { %v2280_v52 = vsel %vm481_vm1, %v2279_v50, 0.0  ;;  %3018 = vmatpush3.bf16.msra.mxu1 %v3017_v4 }
 0xd6c   : > { %2281 = vadd.xlane.f32.xlu1 %v2280_v52 }
 0xdf9   : > { %v2282_v53 = vpop.xlane.xlu1 %2281 }
 0xdfa   : > { %v2283_v54 = vmul.f32 0.03125, %v2282_v53 }
 0xdfc   : > { %v2284_v55 = vsub.f32 %v2279_v50, %v2283_v54 }
 0xdfe   : > { %v2285_v56 = vmul.f32 %v2284_v55, %v2284_v55 }
 0xe00   : > { %v2286_v57 = vsel %vm481_vm1, %v2285_v56, 0.0 }
 0xe01   : > { %2287 = vadd.xlane.f32.xlu0 %v2286_v57 }
 0xe8e   : > { %v2288_v13 = vpop.xlane.xlu0 %2287 }
 0xe8f   : > { %v2289_v14 = vmul.f32 0.03125, %v2288_v13 }
 0xe91   : > { %v2290_v15 = vadd.f32 1e-05, %v2289_v14 }
 0xe93   : > { %3210 = vrsqrt.f32 %v2290_v15 }
 0xe9d   : > { %v3211_v18 = vpop.eup %3210 }
 0xe9e   : > { %v2292_v20 = vmul.f32 %v3211_v18, %v2284_v55 }
 0xea0   : > { %v2297_v22 = vmul.f32 %v2296_v17, %v2292_v20 }
 0xea2   : > { %v2302_v23 = vadd.f32 %v2301_v21, %v2297_v22 }
 0xea4   : > { %2932 = vmatmul.mubr.msk.f32.vlgmr.msra.gmra.mrb[24].mxu1 %vm481_vm1, %v2302_v23 }
 0xf77   : > { %v2376_v26 = vpop.f32.mrb[24].mxu1 }
 0xf78   : > { %v2380_v27 = vmax.f32 %v2376_v26, 0.0  ;;  %v2933_v28 = vpop.f32.mrb[25].mxu1 }
 0xf7a   : > { %2951 = vmatmul.mubr.msk.f32.vlgmr.msra.gmra.mrb[18].mxu0 %vm2389_vm7, %v2380_v27 }
0x104d   : > { %v2459_v29 = vpop.f32.mrb[18].mxu0 }
0x104e   : > { %v2463_v30 = vadd.f32 %v2459_v29, %v2302_v23  ;;  %v2952_v31 = vpop.f32.mrb[19].mxu0 }
0x1050   : > { %v2464_v32 = vsel %vm481_vm1, %v2463_v30, 0.0 }
0x1051   : > { %2465 = vadd.xlane.f32.xlu0 %v2464_v32 }
0x10de   : > { %v2466_v33 = vpop.xlane.xlu0 %2465 }
0x10df   : > { %v2467_v34 = vmul.f32 0.03125, %v2466_v33 }
0x10e1   : > { %v2468_v35 = vsub.f32 %v2463_v30, %v2467_v34 }
0x10e3   : > { %v2469_v36 = vmul.f32 %v2468_v35, %v2468_v35 }
0x10e5   : > { %v2470_v37 = vsel %vm481_vm1, %v2469_v36, 0.0 }
0x10e6   : > { %2471 = vadd.xlane.f32.xlu1 %v2470_v37 }
0x1173   : > { %v2472_v38 = vpop.xlane.xlu1 %2471 }
0x1174   : > { %v2473_v39 = vmul.f32 0.03125, %v2472_v38 }
0x1176   : > { %v2474_v40 = vadd.f32 1e-05, %v2473_v39 }
0x1178   : > { %3212 = vrsqrt.f32 %v2474_v40 }
0x1182   : > { %v3213_v44 = vpop.eup %3212 }
0x1183   : > { %v2476_v8 = vmul.f32 %v3213_v44, %v2468_v35 }
0x1185   : > { %v2481_v46 = vmul.f32 %v2480_v43, %v2476_v8 }
0x1187   : > { %v2486_v47 = vadd.f32 %v2485_v45, %v2481_v46 }
0x1189   : > { %2487 = vst.msk [vmem:[%s461_s25] sm:$0xff] %vm481_vm1, %v2486_v47 }
0x118a   : > { %3397 = shalt.err (!%p3394_p6)
}
0x118b   : > { %s3398_s9 = scalar_lea.hbm %s4079_s10, 128  ;;  %s3402_s25 = scalar_lea.hbm %s4162_s20, 256 }
0x118c   : > { %p3399_p10 = scmp.ne.s32.totalorder %s4079_s10, %s3398_s9  ;;  %p3403_p5 = scmp.lt.u32.totalorder %s4079_s10, %s4162_s20 }
0x118d   : > { %p3404_p9 = scmp.lt.u32.totalorder %s3402_s25, %s3398_s9  ;;  %p3406_p4 = scmp.lt.u32.totalorder %s3398_s9, %s4079_s10 }
0x118e   : > { %p3400_p11 = pnand %p3399_p10, %p4163_p12 }
0x118f   : > { %p3405_p7 = por %p3404_p9, %p3403_p5 }
0x1190   : > { %p3401_p8 = pneg %p3400_p11 }
0x1191   : > { %p3407_p13 = por %p3406_p4, %p3405_p7 }
0x1193   : > { %p3408_p1 = pnand %p3407_p13, %p3401_p8 }
0x1195   : > { %3411 = shalt.err (!%p3408_p1)
}
0x1196   : > { %3053 = dma.vmem_to_hbm [thread:$0]  (%p4163_p12), %s4081_s23, 128, %s4079_s10, %s2489_s30  }
0x1197 PF: > { %s2514_s21 = sand.u32 1, %s3450_s13   ;;  %p4164_p3 = scmp.ne.s32.totalorder %s4150_s29, 0 }
0x1198   : > { %p4165_p2 = scmp.ge.s32.totalorder %s3462_s16, 2  ;;  %s2515_s19 = scalar_lea.sflag [#allocation4], %s2514_s21 }
0x119a   : > { %p3076_p0 = pnand %p4165_p2, %p4164_p3 }
0x119c   : > { %3445 = dma.done.wait (!%p3076_p0), %s2515_s19, 128  }
0x119d   : > { %3447 = vsyncadd (!%p3076_p0), %s2515_s19, 4294967168  ;;  %p26_p6 = scmp.ge.s32.totalorder %s3709_s11, 4   ;;  %s4166_s13 = smov %s3454_s14 }
0x119e   : > { %s4167_s14 = smov %s3458_s15  ;;  %s4168_s15 = smov %s3721_s4 }
0x119f   : > { %s4169_s16 = smov %s3709_s11  ;;  %28 = sbr.rel (!%p26_p6) target bundleno = 12 (0xc), region = 128 }
0x11a6   :  { %2520 = vsyncpa [#allocation3], 1 }
0x11a7   :  { %2522 = vsyncpa [#allocation3 + $0x1], 1 }
0x11a8   :  { %2523 = vsyncpa [#allocation6], 1 }
0x11a9   :  { %2524 = vsyncpa [#allocation9], 1 }
0x11aa   :  { %2525 = vsyncpa [#allocation12], 1 }
0x11ab   :  { %2526 = vsyncpa [#allocation4], 1 }
0x11ac   :  { %2528 = vsyncpa [#allocation4 + $0x1], 1 }

</bundles_post_ra>
